<compile_context>
chip_gen: v5e
topology: v5e:2x2
jax: 0.10.0
libtpu: 0.0.40
codegen_flags: <defaults>
</compile_context>

<pallas_src>
import functools
import math

import jax
import jax.numpy as jnp
from jax import lax
from jax.experimental import pallas as pl
from jax.experimental.pallas import tpu as pltpu

EPS = 1e-8          # torch.nn.LayerNorm(..., eps=1e-08) in the baseline
F32 = jnp.float32
BF16 = jnp.bfloat16
NEG_BIG = -1e30


# ----------------------------- in-kernel helpers -----------------------------

def _ln(x, g, b):
    mu = jnp.mean(x, axis=-1, keepdims=True)
    var = jnp.mean((x - mu) ** 2, axis=-1, keepdims=True)
    return (x - mu) * lax.rsqrt(var + EPS) * g + b


def _proj(x3, w):
    # (Bb, L, Din) @ (Din, Dout) -> (Bb, L, Dout); M = Bb*L rows on the MXU,
    # f32 accumulation.
    return lax.dot_general(x3, w, (((2,), (0,)), ((), ())),
                           preferred_element_type=F32)


# ----------------------------- fused stack kernel -----------------------------

def _block_kernel(x_ref, keep_ref, pos_ref, feat_ref,
                  ln1_g, ln1_b, wq, bq, wkv, bkv, wpp, bpp, wff, bff, wo, bo,
                  ln2_g, ln2_b, w1, b1, w2, b2,
                  last_g, last_b,
                  o_ref,
                  q_sc, kv_sc, pp_sc, ff_sc, acc_sc,
                  *, num_heads):
    blk = pl.program_id(1)
    nblk = pl.num_programs(1)

    keep = keep_ref[...]                       # (Bb, L, 1)

    @pl.when(blk == 0)
    def _():
        # emb_dropout is identity; zero padded positions once, then the
        # activation lives in o_ref (VMEM) across the block axis.
        o_ref[...] = x_ref[...] * keep

    x = o_ref[...]                             # resident f32 activation carry
    Bb, L, H = x.shape
    dh = H // num_heads

    # ---- pre-attention LayerNorm (query path), f32 ----
    qn = _ln(x, ln1_g[...], ln1_b[...])

    # ---- fused projections: bf16 MXU operands, f32 accumulate, bf16 stash ----
    # Weights are pre-transposed to (in, out); 1/sqrt(dh) pre-folded into the
    # q / qp / qf halves host-side.
    q_sc[...] = (_proj(qn.astype(BF16), wq[...]) + bq[...]).astype(BF16)
    kv_sc[...] = (_proj(x.astype(BF16), wkv[...]) + bkv[...]).astype(BF16)
    pp_sc[...] = (_proj(pos_ref[...].astype(BF16), wpp[...]) + bpp[...]).astype(BF16)
    ff_sc[...] = (_proj(feat_ref[...].astype(BF16), wff[...]) + bff[...]).astype(BF16)

    # ---- causal additive mask generated in-kernel (no (L,L) HBM input) ----
    row = lax.broadcasted_iota(jnp.int32, (L, L), 0)
    col = lax.broadcasted_iota(jnp.int32, (L, L), 1)
    causal = jnp.where(row >= col, 0.0, NEG_BIG).astype(F32)[None]   # (1, L, L)

    acc_sc[...] = jnp.zeros_like(acc_sc)

    # ---- decoupled DIF attention: sum-of-dots per head (no lane concats),
    #      output projection folded into the head loop (no ctx concat). ----
    # TODO(synk): for large num_heads/L switch to a fori_loop with dynamic
    # pl.ds head indexing to bound live ranges further.
    for h in range(num_heads):
        lo, hi = h * dh, (h + 1) * dh
        qh = q_sc[:, :, lo:hi]
        kh = kv_sc[:, :, lo:hi]
        vh = kv_sc[:, :, H + lo:H + hi]
        qph = pp_sc[:, :, lo:hi]
        kph = pp_sc[:, :, H + lo:H + hi]
        qfh = ff_sc[:, :, lo:hi]
        kfh = ff_sc[:, :, H + lo:H + hi]

        s = (jnp.einsum('bqd,bkd->bqk', qh, kh, preferred_element_type=F32)
             + jnp.einsum('bqd,bkd->bqk', qph, kph, preferred_element_type=F32)
             + jnp.einsum('bqd,bkd->bqk', qfh, kfh, preferred_element_type=F32))
        s = s + causal

        m = jnp.max(s, axis=-1, keepdims=True)
        p = jnp.exp(s - m)
        inv = pl.reciprocal(jnp.sum(p, axis=-1, keepdims=True), approx=True)
        ctx = jnp.einsum('bqk,bkd->bqd', (p * inv).astype(BF16), vh,
                         preferred_element_type=F32)            # (Bb, L, dh)

        # Wo row-slice is sublane-aligned (dh multiple of 8): accumulate the
        # output projection per head instead of concatenating ctx lanes.
        acc_sc[...] += _proj(ctx.astype(BF16), wo[lo:hi, :])

    attn_out = acc_sc[...] + bo[...]
    y = attn_out + qn                          # residual: queries += Q

    # ---- forward LayerNorm + PointWiseFeedForward (1x1 conv -> relu -> 1x1 conv + residual)
    y = _ln(y, ln2_g[...], ln2_b[...])
    h1 = jnp.maximum(_proj(y.astype(BF16), w1[...]) + b1[...], 0.0)
    out = _proj(h1.astype(BF16), w2[...]) + b2[...] + y

    out = out * keep                           # re-apply padding mask
    o_ref[...] = out                           # carry to next block

    @pl.when(blk == nblk - 1)
    def _():
        o_ref[...] = _ln(out, last_g[...], last_b[...])   # fused final LN


# ----------------------------- host-side wrapper -----------------------------

def _pick_batch_tile(B, L, target_rows=256):
    """Bb so that Bb*L ~ target MXU rows, Bb | B, and >= 2 grid steps when
    the batch allows (v7x has two TensorCores)."""
    bb = max(1, min(B, target_rows // max(L, 1)))
    while B % bb:
        bb -= 1
    if B // bb < 2 and B >= 2:
        bb = max(1, bb // 2)
        while B % bb:
            bb -= 1
    return bb


def _vmem_limit_bytes():
    # ~3/4 of the chip's VMEM (v5e/v6e: 128 MiB -> 96 MiB; v7x: 64 -> 48 MiB).
    try:
        cap = int(pltpu.get_tpu_info().vmem_capacity_bytes)
    except Exception:
        cap = 64 * 1024 * 1024
    return max(32 * 1024 * 1024, min((cap * 3) // 4, 96 * 1024 * 1024))


def multihead_attention_forward(prepared, queries, timeline_mask,
                                position_embedding, feat_embedding,
                                *, num_heads):
    B, L, H = queries.shape
    num_blocks = prepared["wq"].shape[0]
    keep = jnp.logical_not(timeline_mask)[..., None].astype(queries.dtype)  # (B,L,1)

    Bb = _pick_batch_tile(B, L)
    grid = (B // Bb, num_blocks)

    act_spec = pl.BlockSpec((Bb, L, H), lambda b, k: (b, 0, 0))
    keep_spec = pl.BlockSpec((Bb, L, 1), lambda b, k: (b, 0, 0))

    def blk_wspec(arr):      # per-block weight: leading block axis squeezed
        s = arr.shape[1:]
        return pl.BlockSpec((None,) + s, lambda b, k, _n=len(s): (k,) + (0,) * _n)

    def shared_wspec(arr):   # block-independent weight (last LayerNorm)
        s = arr.shape
        return pl.BlockSpec(s, lambda b, k, _n=len(s): (0,) * _n)

    per_block_names = ("ln1_g", "ln1_b", "wq", "bq", "wkv", "bkv", "wpp", "bpp",
                       "wff", "bff", "wo", "bo", "ln2_g", "ln2_b",
                       "w1", "b1", "w2", "b2")
    per_block = [prepared[n] for n in per_block_names]
    shared = [prepared["last_g"], prepared["last_b"]]

    kernel = functools.partial(_block_kernel, num_heads=num_heads)

    return pl.pallas_call(
        kernel,
        out_shape=jax.ShapeDtypeStruct((B, L, H), queries.dtype),
        grid=grid,
        in_specs=[act_spec, keep_spec, act_spec, act_spec]
                 + [blk_wspec(a) for a in per_block]
                 + [shared_wspec(a) for a in shared],
        out_specs=act_spec,
        scratch_shapes=[
            pltpu.VMEM((Bb, L, H), BF16),        # q
            pltpu.VMEM((Bb, L, 2 * H), BF16),    # k | v
            pltpu.VMEM((Bb, L, 2 * H), BF16),    # qp | kp
            pltpu.VMEM((Bb, L, 2 * H), BF16),    # qf | kf
            pltpu.VMEM((Bb, L, H), F32),         # attention-output accumulator
        ],
        compiler_params=pltpu.CompilerParams(
            dimension_semantics=("parallel", "arbitrary"),
            vmem_limit_bytes=_vmem_limit_bytes()),
    )(queries, keep, position_embedding, feat_embedding, *per_block, *shared)


# ----------------------------- one-time weight prep -----------------------------

def prepare_params(params, num_heads):
    """Host-side, done ONCE: transpose to (in, out), concatenate projections
    sharing an input, fold 1/sqrt(dh) into the q/qp/qf weights & biases,
    cast matmul weights to bf16, stack across blocks with a leading axis."""
    H = params["blocks"][0]["attn"]["wq"].shape[0]
    dh = H // num_heads
    scale = 1.0 / math.sqrt(dh)

    per = []
    for blk in params["blocks"]:
        a, f = blk["attn"], blk["ffn"]
        per.append({
            "ln1_g": blk["attn_ln_g"].reshape(1, H).astype(F32),
            "ln1_b": blk["attn_ln_b"].reshape(1, H).astype(F32),
            "wq": (a["wq"].T * scale).astype(BF16),
            "bq": (a["bq"] * scale).reshape(1, H).astype(F32),
            "wkv": jnp.concatenate([a["wk"], a["wv"]], axis=0).T.astype(BF16),
            "bkv": jnp.concatenate([a["bk"], a["bv"]]).reshape(1, 2 * H).astype(F32),
            "wpp": jnp.concatenate([a["wqp"] * scale, a["wkp"]], axis=0).T.astype(BF16),
            "bpp": jnp.concatenate([a["bqp"] * scale, a["bkp"]]).reshape(1, 2 * H).astype(F32),
            "wff": jnp.concatenate([a["wqf"] * scale, a["wkf"]], axis=0).T.astype(BF16),
            "bff": jnp.concatenate([a["bqf"] * scale, a["bkf"]]).reshape(1, 2 * H).astype(F32),
            "wo": a["wo"].T.astype(BF16),
            "bo": a["bo"].reshape(1, H).astype(F32),
            "ln2_g": blk["fwd_ln_g"].reshape(1, H).astype(F32),
            "ln2_b": blk["fwd_ln_b"].reshape(1, H).astype(F32),
            "w1": f["w1"].T.astype(BF16),
            "b1": f["b1"].reshape(1, H).astype(F32),
            "w2": f["w2"].T.astype(BF16),
            "b2": f["b2"].reshape(1, H).astype(F32),
        })

    prepared = {k: jnp.stack([d[k] for d in per], axis=0) for k in per[0]}
    prepared["last_g"] = params["last_ln_g"].reshape(1, H).astype(F32)
    prepared["last_b"] = params["last_ln_b"].reshape(1, H).astype(F32)
    return prepared


# ----------------------------- parameter init -----------------------------

def _lin_init(key, out_dim, in_dim, scale=0.05):
    kw, kb = jax.random.split(key)
    w = jax.random.normal(kw, (out_dim, in_dim), F32) * scale
    b = jax.random.normal(kb, (out_dim,), F32) * 0.01
    return w, b


def init_params(key, hidden, num_blocks):
    params = {"last_ln_g": jnp.ones((hidden,), F32),
              "last_ln_b": jnp.zeros((hidden,), F32),
              "blocks": []}
    for i in range(num_blocks):
        bkey = jax.random.fold_in(key, i)
        ks = jax.random.split(bkey, 16)
        attn = {}
        for j, name in enumerate(["q", "k", "v", "qp", "kp", "qf", "kf", "o"]):
            w, b = _lin_init(ks[j], hidden, hidden)
            attn["w" + name] = w
            attn["b" + name] = b
        w1, b1 = _lin_init(ks[8], hidden, hidden)
        w2, b2 = _lin_init(ks[9], hidden, hidden)
        params["blocks"].append({
            "attn_ln_g": jnp.ones((hidden,), F32),
            "attn_ln_b": jnp.zeros((hidden,), F32),
            "fwd_ln_g": jnp.ones((hidden,), F32),
            "fwd_ln_b": jnp.zeros((hidden,), F32),
            "attn": attn,
            "ffn": {"w1": w1, "b1": b1, "w2": w2, "b2": b2},
        })
    return params


# ----------------------------- main -----------------------------

if __name__ == "__main__":
    B, L, H = 2, 8, 32        # batch, maxlen, hidden_units
    NUM_HEADS = 2
    NUM_BLOCKS = 2

    root = jax.random.PRNGKey(0)
    k_par, k_q, k_pos, k_feat = jax.random.split(root, 4)

    params = init_params(k_par, H, NUM_BLOCKS)
    prepared = prepare_params(params, NUM_HEADS)   # one-time host-side prep

    queries = jax.random.normal(k_q, (B, L, H), F32)
    position_embedding = jax.random.normal(k_pos, (B, L, H), F32)
    feat_embedding = jax.random.normal(k_feat, (B, L, H), F32)
    # padding mask: first sequence has 2 padded trailing positions
    lengths = jnp.array([6, 8], dtype=jnp.int32)
    timeline_mask = jnp.arange(L)[None, :] >= lengths[:, None]   # True = pad

    out = multihead_attention_forward(
        prepared, queries, timeline_mask, position_embedding, feat_embedding,
        num_heads=NUM_HEADS)
    out = jax.block_until_ready(out)

    assert out.shape == (B, L, H) and out.dtype == F32
    assert bool(jnp.all(jnp.isfinite(out)))
    print("KERNEL_OK")
</pallas_src>

<mosaic_0001>
module attributes {stable_mosaic.version = 11 : i64} {
  func.func @_block_kernel(%arg0: i32, %arg1: i32, %arg2: memref<1x8x32xf32, #tpu.memory_space<vmem>>, %arg3: memref<1x8x1xf32, #tpu.memory_space<vmem>>, %arg4: memref<1x8x32xf32, #tpu.memory_space<vmem>>, %arg5: memref<1x8x32xf32, #tpu.memory_space<vmem>>, %arg6: memref<1x1x32xf32, #tpu.memory_space<vmem>>, %arg7: memref<1x1x32xf32, #tpu.memory_space<vmem>>, %arg8: memref<1x32x32xbf16, #tpu.memory_space<vmem>>, %arg9: memref<1x1x32xf32, #tpu.memory_space<vmem>>, %arg10: memref<1x32x64xbf16, #tpu.memory_space<vmem>>, %arg11: memref<1x1x64xf32, #tpu.memory_space<vmem>>, %arg12: memref<1x32x64xbf16, #tpu.memory_space<vmem>>, %arg13: memref<1x1x64xf32, #tpu.memory_space<vmem>>, %arg14: memref<1x32x64xbf16, #tpu.memory_space<vmem>>, %arg15: memref<1x1x64xf32, #tpu.memory_space<vmem>>, %arg16: memref<1x32x32xbf16, #tpu.memory_space<vmem>>, %arg17: memref<1x1x32xf32, #tpu.memory_space<vmem>>, %arg18: memref<1x1x32xf32, #tpu.memory_space<vmem>>, %arg19: memref<1x1x32xf32, #tpu.memory_space<vmem>>, %arg20: memref<1x32x32xbf16, #tpu.memory_space<vmem>>, %arg21: memref<1x1x32xf32, #tpu.memory_space<vmem>>, %arg22: memref<1x32x32xbf16, #tpu.memory_space<vmem>>, %arg23: memref<1x1x32xf32, #tpu.memory_space<vmem>>, %arg24: memref<1x32xf32, #tpu.memory_space<vmem>>, %arg25: memref<1x32xf32, #tpu.memory_space<vmem>>, %arg26: memref<1x8x32xf32, #tpu.memory_space<vmem>>, %arg27: memref<1x8x32xbf16, #tpu.memory_space<vmem>>, %arg28: memref<1x8x64xbf16, #tpu.memory_space<vmem>>, %arg29: memref<1x8x64xbf16, #tpu.memory_space<vmem>>, %arg30: memref<1x8x64xbf16, #tpu.memory_space<vmem>>, %arg31: memref<1x8x32xf32, #tpu.memory_space<vmem>>) attributes {dimension_semantics = [#tpu.dimension_semantics<parallel>, #tpu.dimension_semantics<arbitrary>], iteration_bounds = array<i64: 2, 2>, scalar_prefetch = 0 : i64, scratch_operands = 5 : i64, tpu.core_type = #tpu.core_type<tc>, window_params = [{transform_indices = @transform_0, window_bounds = array<i64: 1, 8, 32>}, {transform_indices = @transform_1, window_bounds = array<i64: 1, 8, 1>}, {transform_indices = @transform_2, window_bounds = array<i64: 1, 8, 32>}, {transform_indices = @transform_3, window_bounds = array<i64: 1, 8, 32>}, {transform_indices = @transform_4, window_bounds = array<i64: 1, 1, 32>}, {transform_indices = @transform_5, window_bounds = array<i64: 1, 1, 32>}, {transform_indices = @transform_6, window_bounds = array<i64: 1, 32, 32>}, {transform_indices = @transform_7, window_bounds = array<i64: 1, 1, 32>}, {transform_indices = @transform_8, window_bounds = array<i64: 1, 32, 64>}, {transform_indices = @transform_9, window_bounds = array<i64: 1, 1, 64>}, {transform_indices = @transform_10, window_bounds = array<i64: 1, 32, 64>}, {transform_indices = @transform_11, window_bounds = array<i64: 1, 1, 64>}, {transform_indices = @transform_12, window_bounds = array<i64: 1, 32, 64>}, {transform_indices = @transform_13, window_bounds = array<i64: 1, 1, 64>}, {transform_indices = @transform_14, window_bounds = array<i64: 1, 32, 32>}, {transform_indices = @transform_15, window_bounds = array<i64: 1, 1, 32>}, {transform_indices = @transform_16, window_bounds = array<i64: 1, 1, 32>}, {transform_indices = @transform_17, window_bounds = array<i64: 1, 1, 32>}, {transform_indices = @transform_18, window_bounds = array<i64: 1, 32, 32>}, {transform_indices = @transform_19, window_bounds = array<i64: 1, 1, 32>}, {transform_indices = @transform_20, window_bounds = array<i64: 1, 32, 32>}, {transform_indices = @transform_21, window_bounds = array<i64: 1, 1, 32>}, {pipeline_mode = #tpu.pipeline_mode<synchronous>, transform_indices = @transform_22, window_bounds = array<i64: 1, 32>}, {pipeline_mode = #tpu.pipeline_mode<synchronous>, transform_indices = @transform_23, window_bounds = array<i64: 1, 32>}, {transform_indices = @transform_24, window_bounds = array<i64: 1, 8, 32>}]} {
    %c0 = arith.constant 0 : index
    %c0_0 = arith.constant 0 : index
    %c0_1 = arith.constant 0 : index
    %0 = vector.load %arg3[%c0, %c0_0, %c0_1] : memref<1x8x1xf32, #tpu.memory_space<vmem>>, vector<1x8x1xf32>
    %c0_i32 = arith.constant 0 : i32
    %1 = arith.cmpi eq, %arg1, %c0_i32 : i32
    %2 = arith.extui %1 : i1 to i32
    %c0_i32_2 = arith.constant 0 : i32
    %3 = arith.cmpi ne, %2, %c0_i32_2 : i32
    scf.if %3 {
      %c0_175 = arith.constant 0 : index
      %c0_176 = arith.constant 0 : index
      %c0_177 = arith.constant 0 : index
      %214 = vector.load %arg2[%c0_175, %c0_176, %c0_177] : memref<1x8x32xf32, #tpu.memory_space<vmem>>, vector<1x8x32xf32>
      %215 = vector.broadcast %0 : vector<1x8x1xf32> to vector<1x8x32xf32>
      %216 = arith.mulf %214, %215 : vector<1x8x32xf32>
      %c0_178 = arith.constant 0 : index
      %c0_179 = arith.constant 0 : index
      %c0_180 = arith.constant 0 : index
      %217 = vector.load %arg26[%c0_178, %c0_179, %c0_180] : memref<1x8x32xf32, #tpu.memory_space<vmem>>, vector<1x8x32xf32>
      tpu.vector_store %arg26[%c0_178, %c0_179, %c0_180], %216 {strides = array<i32>} : memref<1x8x32xf32, #tpu.memory_space<vmem>>, vector<1x8x32xf32>,
    } else {
    }
    %c0_3 = arith.constant 0 : index
    %c0_4 = arith.constant 0 : index
    %c0_5 = arith.constant 0 : index
    %4 = vector.load %arg26[%c0_3, %c0_4, %c0_5] : memref<1x8x32xf32, #tpu.memory_space<vmem>>, vector<1x8x32xf32>
    %c0_6 = arith.constant 0 : index
    %c0_7 = arith.constant 0 : index
    %c0_8 = arith.constant 0 : index
    %5 = vector.load %arg6[%c0_6, %c0_7, %c0_8] : memref<1x1x32xf32, #tpu.memory_space<vmem>>, vector<1x1x32xf32>
    %6 = vector.shape_cast %5 : vector<1x1x32xf32> to vector<1x32xf32>
    %c0_9 = arith.constant 0 : index
    %c0_10 = arith.constant 0 : index
    %c0_11 = arith.constant 0 : index
    %7 = vector.load %arg7[%c0_9, %c0_10, %c0_11] : memref<1x1x32xf32, #tpu.memory_space<vmem>>, vector<1x1x32xf32>
    %8 = vector.shape_cast %7 : vector<1x1x32xf32> to vector<1x32xf32>
    %cst = arith.constant dense<0.000000e+00> : vector<1x8xf32>
    %9 = vector.multi_reduction <add>, %4, %cst [2] : vector<1x8x32xf32> to vector<1x8xf32>
    %10 = vector.shape_cast %9 : vector<1x8xf32> to vector<1x8x1xf32>
    %cst_12 = arith.constant 3.200000e+01 : f32
    %11 = vector.broadcast %cst_12 : f32 to vector<1x8x1xf32>
    %12 = arith.divf %10, %11 : vector<1x8x1xf32>
    %13 = vector.broadcast %12 : vector<1x8x1xf32> to vector<1x8x32xf32>
    %14 = arith.subf %4, %13 : vector<1x8x32xf32>
    %15 = arith.mulf %14, %14 : vector<1x8x32xf32>
    %cst_13 = arith.constant dense<0.000000e+00> : vector<1x8xf32>
    %16 = vector.multi_reduction <add>, %15, %cst_13 [2] : vector<1x8x32xf32> to vector<1x8xf32>
    %17 = vector.shape_cast %16 : vector<1x8xf32> to vector<1x8x1xf32>
    %cst_14 = arith.constant 3.200000e+01 : f32
    %18 = vector.broadcast %cst_14 : f32 to vector<1x8x1xf32>
    %19 = arith.divf %17, %18 : vector<1x8x1xf32>
    %20 = vector.broadcast %12 : vector<1x8x1xf32> to vector<1x8x32xf32>
    %21 = arith.subf %4, %20 : vector<1x8x32xf32>
    %cst_15 = arith.constant 9.99999993E-9 : f32
    %22 = vector.broadcast %cst_15 : f32 to vector<1x8x1xf32>
    %23 = arith.addf %19, %22 : vector<1x8x1xf32>
    %24 = math.rsqrt %23 : vector<1x8x1xf32>
    %25 = vector.broadcast %24 : vector<1x8x1xf32> to vector<1x8x32xf32>
    %26 = arith.mulf %21, %25 : vector<1x8x32xf32>
    %27 = vector.shape_cast %6 : vector<1x32xf32> to vector<1x1x32xf32>
    %28 = vector.broadcast %27 : vector<1x1x32xf32> to vector<1x8x32xf32>
    %29 = arith.mulf %26, %28 : vector<1x8x32xf32>
    %30 = vector.shape_cast %8 : vector<1x32xf32> to vector<1x1x32xf32>
    %31 = vector.broadcast %30 : vector<1x1x32xf32> to vector<1x8x32xf32>
    %32 = arith.addf %29, %31 : vector<1x8x32xf32>
    %33 = arith.truncf %32 : vector<1x8x32xf32> to vector<1x8x32xbf16>
    %c0_16 = arith.constant 0 : index
    %c0_17 = arith.constant 0 : index
    %c0_18 = arith.constant 0 : index
    %34 = vector.load %arg8[%c0_16, %c0_17, %c0_18] : memref<1x32x32xbf16, #tpu.memory_space<vmem>>, vector<1x32x32xbf16>
    %35 = vector.shape_cast %34 : vector<1x32x32xbf16> to vector<32x32xbf16>
    %cst_19 = arith.constant dense<0.000000e+00> : vector<1x8x32xf32>
    %36 = tpu.matmul %33, %35, %cst_19 {dimension_numbers = #tpu.dot_dimension_numbers<[2], [0], [0, 1], [1], [0, 0, 0, 1, 1, 1], [], []>} : vector<1x8x32xbf16>, vector<32x32xbf16>, vector<1x8x32xf32> -> vector<1x8x32xf32>
    %c0_20 = arith.constant 0 : index
    %c0_21 = arith.constant 0 : index
    %c0_22 = arith.constant 0 : index
    %37 = vector.load %arg9[%c0_20, %c0_21, %c0_22] : memref<1x1x32xf32, #tpu.memory_space<vmem>>, vector<1x1x32xf32>
    %38 = vector.shape_cast %37 : vector<1x1x32xf32> to vector<1x32xf32>
    %39 = vector.shape_cast %38 : vector<1x32xf32> to vector<1x1x32xf32>
    %40 = vector.broadcast %39 : vector<1x1x32xf32> to vector<1x8x32xf32>
    %41 = arith.addf %36, %40 : vector<1x8x32xf32>
    %42 = arith.truncf %41 : vector<1x8x32xf32> to vector<1x8x32xbf16>
    %c0_23 = arith.constant 0 : index
    %c0_24 = arith.constant 0 : index
    %c0_25 = arith.constant 0 : index
    %43 = vector.load %arg27[%c0_23, %c0_24, %c0_25] : memref<1x8x32xbf16, #tpu.memory_space<vmem>>, vector<1x8x32xbf16>
    tpu.vector_store %arg27[%c0_23, %c0_24, %c0_25], %42 {strides = array<i32>} : memref<1x8x32xbf16, #tpu.memory_space<vmem>>, vector<1x8x32xbf16>,
    %44 = arith.truncf %4 : vector<1x8x32xf32> to vector<1x8x32xbf16>
    %c0_26 = arith.constant 0 : index
    %c0_27 = arith.constant 0 : index
    %c0_28 = arith.constant 0 : index
    %45 = vector.load %arg10[%c0_26, %c0_27, %c0_28] : memref<1x32x64xbf16, #tpu.memory_space<vmem>>, vector<1x32x64xbf16>
    %46 = vector.shape_cast %45 : vector<1x32x64xbf16> to vector<32x64xbf16>
    %cst_29 = arith.constant dense<0.000000e+00> : vector<1x8x64xf32>
    %47 = tpu.matmul %44, %46, %cst_29 {dimension_numbers = #tpu.dot_dimension_numbers<[2], [0], [0, 1], [1], [0, 0, 0, 1, 1, 1], [], []>} : vector<1x8x32xbf16>, vector<32x64xbf16>, vector<1x8x64xf32> -> vector<1x8x64xf32>
    %c0_30 = arith.constant 0 : index
    %c0_31 = arith.constant 0 : index
    %c0_32 = arith.constant 0 : index
    %48 = vector.load %arg11[%c0_30, %c0_31, %c0_32] : memref<1x1x64xf32, #tpu.memory_space<vmem>>, vector<1x1x64xf32>
    %49 = vector.shape_cast %48 : vector<1x1x64xf32> to vector<1x64xf32>
    %50 = vector.shape_cast %49 : vector<1x64xf32> to vector<1x1x64xf32>
    %51 = vector.broadcast %50 : vector<1x1x64xf32> to vector<1x8x64xf32>
    %52 = arith.addf %47, %51 : vector<1x8x64xf32>
    %53 = arith.truncf %52 : vector<1x8x64xf32> to vector<1x8x64xbf16>
    %c0_33 = arith.constant 0 : index
    %c0_34 = arith.constant 0 : index
    %c0_35 = arith.constant 0 : index
    %54 = vector.load %arg28[%c0_33, %c0_34, %c0_35] : memref<1x8x64xbf16, #tpu.memory_space<vmem>>, vector<1x8x64xbf16>
    tpu.vector_store %arg28[%c0_33, %c0_34, %c0_35], %53 {strides = array<i32>} : memref<1x8x64xbf16, #tpu.memory_space<vmem>>, vector<1x8x64xbf16>,
    %c0_36 = arith.constant 0 : index
    %c0_37 = arith.constant 0 : index
    %c0_38 = arith.constant 0 : index
    %55 = vector.load %arg4[%c0_36, %c0_37, %c0_38] : memref<1x8x32xf32, #tpu.memory_space<vmem>>, vector<1x8x32xf32>
    %56 = arith.truncf %55 : vector<1x8x32xf32> to vector<1x8x32xbf16>
    %c0_39 = arith.constant 0 : index
    %c0_40 = arith.constant 0 : index
    %c0_41 = arith.constant 0 : index
    %57 = vector.load %arg12[%c0_39, %c0_40, %c0_41] : memref<1x32x64xbf16, #tpu.memory_space<vmem>>, vector<1x32x64xbf16>
    %58 = vector.shape_cast %57 : vector<1x32x64xbf16> to vector<32x64xbf16>
    %cst_42 = arith.constant dense<0.000000e+00> : vector<1x8x64xf32>
    %59 = tpu.matmul %56, %58, %cst_42 {dimension_numbers = #tpu.dot_dimension_numbers<[2], [0], [0, 1], [1], [0, 0, 0, 1, 1, 1], [], []>} : vector<1x8x32xbf16>, vector<32x64xbf16>, vector<1x8x64xf32> -> vector<1x8x64xf32>
    %c0_43 = arith.constant 0 : index
    %c0_44 = arith.constant 0 : index
    %c0_45 = arith.constant 0 : index
    %60 = vector.load %arg13[%c0_43, %c0_44, %c0_45] : memref<1x1x64xf32, #tpu.memory_space<vmem>>, vector<1x1x64xf32>
    %61 = vector.shape_cast %60 : vector<1x1x64xf32> to vector<1x64xf32>
    %62 = vector.shape_cast %61 : vector<1x64xf32> to vector<1x1x64xf32>
    %63 = vector.broadcast %62 : vector<1x1x64xf32> to vector<1x8x64xf32>
    %64 = arith.addf %59, %63 : vector<1x8x64xf32>
    %65 = arith.truncf %64 : vector<1x8x64xf32> to vector<1x8x64xbf16>
    %c0_46 = arith.constant 0 : index
    %c0_47 = arith.constant 0 : index
    %c0_48 = arith.constant 0 : index
    %66 = vector.load %arg29[%c0_46, %c0_47, %c0_48] : memref<1x8x64xbf16, #tpu.memory_space<vmem>>, vector<1x8x64xbf16>
    tpu.vector_store %arg29[%c0_46, %c0_47, %c0_48], %65 {strides = array<i32>} : memref<1x8x64xbf16, #tpu.memory_space<vmem>>, vector<1x8x64xbf16>,
    %c0_49 = arith.constant 0 : index
    %c0_50 = arith.constant 0 : index
    %c0_51 = arith.constant 0 : index
    %67 = vector.load %arg5[%c0_49, %c0_50, %c0_51] : memref<1x8x32xf32, #tpu.memory_space<vmem>>, vector<1x8x32xf32>
    %68 = arith.truncf %67 : vector<1x8x32xf32> to vector<1x8x32xbf16>
    %c0_52 = arith.constant 0 : index
    %c0_53 = arith.constant 0 : index
    %c0_54 = arith.constant 0 : index
    %69 = vector.load %arg14[%c0_52, %c0_53, %c0_54] : memref<1x32x64xbf16, #tpu.memory_space<vmem>>, vector<1x32x64xbf16>
    %70 = vector.shape_cast %69 : vector<1x32x64xbf16> to vector<32x64xbf16>
    %cst_55 = arith.constant dense<0.000000e+00> : vector<1x8x64xf32>
    %71 = tpu.matmul %68, %70, %cst_55 {dimension_numbers = #tpu.dot_dimension_numbers<[2], [0], [0, 1], [1], [0, 0, 0, 1, 1, 1], [], []>} : vector<1x8x32xbf16>, vector<32x64xbf16>, vector<1x8x64xf32> -> vector<1x8x64xf32>
    %c0_56 = arith.constant 0 : index
    %c0_57 = arith.constant 0 : index
    %c0_58 = arith.constant 0 : index
    %72 = vector.load %arg15[%c0_56, %c0_57, %c0_58] : memref<1x1x64xf32, #tpu.memory_space<vmem>>, vector<1x1x64xf32>
    %73 = vector.shape_cast %72 : vector<1x1x64xf32> to vector<1x64xf32>
    %74 = vector.shape_cast %73 : vector<1x64xf32> to vector<1x1x64xf32>
    %75 = vector.broadcast %74 : vector<1x1x64xf32> to vector<1x8x64xf32>
    %76 = arith.addf %71, %75 : vector<1x8x64xf32>
    %77 = arith.truncf %76 : vector<1x8x64xf32> to vector<1x8x64xbf16>
    %c0_59 = arith.constant 0 : index
    %c0_60 = arith.constant 0 : index
    %c0_61 = arith.constant 0 : index
    %78 = vector.load %arg30[%c0_59, %c0_60, %c0_61] : memref<1x8x64xbf16, #tpu.memory_space<vmem>>, vector<1x8x64xbf16>
    tpu.vector_store %arg30[%c0_59, %c0_60, %c0_61], %77 {strides = array<i32>} : memref<1x8x64xbf16, #tpu.memory_space<vmem>>, vector<1x8x64xbf16>,
    %79 = tpu.iota {dimensions = array<i32: 0>} : vector<8x8xi32>
    %80 = tpu.iota {dimensions = array<i32: 1>} : vector<8x8xi32>
    %81 = arith.cmpi sge, %79, %80 : vector<8x8xi32>
    %cst_62 = arith.constant 0.000000e+00 : f32
    %cst_63 = arith.constant -1.000000e+30 : f32
    %82 = vector.broadcast %cst_62 : f32 to vector<8x8xf32>
    %83 = vector.broadcast %cst_63 : f32 to vector<8x8xf32>
    %84 = arith.select %81, %82, %83 : vector<8x8xi1>, vector<8x8xf32>
    %85 = vector.shape_cast %84 : vector<8x8xf32> to vector<1x8x8xf32>
    %cst_64 = arith.constant 0.000000e+00 : f32
    %86 = vector.broadcast %cst_64 : f32 to vector<1x8x32xf32>
    %c0_65 = arith.constant 0 : index
    %c0_66 = arith.constant 0 : index
    %c0_67 = arith.constant 0 : index
    %87 = vector.load %arg31[%c0_65, %c0_66, %c0_67] : memref<1x8x32xf32, #tpu.memory_space<vmem>>, vector<1x8x32xf32>
    tpu.vector_store %arg31[%c0_65, %c0_66, %c0_67], %86 {strides = array<i32>} : memref<1x8x32xf32, #tpu.memory_space<vmem>>, vector<1x8x32xf32>,
    %c0_68 = arith.constant 0 : index
    %c0_69 = arith.constant 0 : index
    %c0_70 = arith.constant 0 : index
    %88 = vector.load %arg27[%c0_68, %c0_69, %c0_70] : memref<1x8x32xbf16, #tpu.memory_space<vmem>>, vector<1x8x16xbf16>
    %c0_71 = arith.constant 0 : index
    %c0_72 = arith.constant 0 : index
    %c0_73 = arith.constant 0 : index
    %89 = vector.load %arg28[%c0_71, %c0_72, %c0_73] : memref<1x8x64xbf16, #tpu.memory_space<vmem>>, vector<1x8x16xbf16>
    %c0_74 = arith.constant 0 : index
    %c0_75 = arith.constant 0 : index
    %c32 = arith.constant 32 : index
    %90 = vector.load %arg28[%c0_74, %c0_75, %c32] : memref<1x8x64xbf16, #tpu.memory_space<vmem>>, vector<1x8x16xbf16>
    %c0_76 = arith.constant 0 : index
    %c0_77 = arith.constant 0 : index
    %c0_78 = arith.constant 0 : index
    %91 = vector.load %arg29[%c0_76, %c0_77, %c0_78] : memref<1x8x64xbf16, #tpu.memory_space<vmem>>, vector<1x8x16xbf16>
    %c0_79 = arith.constant 0 : index
    %c0_80 = arith.constant 0 : index
    %c32_81 = arith.constant 32 : index
    %92 = vector.load %arg29[%c0_79, %c0_80, %c32_81] : memref<1x8x64xbf16, #tpu.memory_space<vmem>>, vector<1x8x16xbf16>
    %c0_82 = arith.constant 0 : index
    %c0_83 = arith.constant 0 : index
    %c0_84 = arith.constant 0 : index
    %93 = vector.load %arg30[%c0_82, %c0_83, %c0_84] : memref<1x8x64xbf16, #tpu.memory_space<vmem>>, vector<1x8x16xbf16>
    %c0_85 = arith.constant 0 : index
    %c0_86 = arith.constant 0 : index
    %c32_87 = arith.constant 32 : index
    %94 = vector.load %arg30[%c0_85, %c0_86, %c32_87] : memref<1x8x64xbf16, #tpu.memory_space<vmem>>, vector<1x8x16xbf16>
    "tpu.trace_start"() <{level = 10 : i32, message = "bqd,bkd->bqk"}> : () -> ()
    %cst_88 = arith.constant dense<0.000000e+00> : vector<1x8x8xf32>
    %95 = tpu.matmul %88, %89, %cst_88 {dimension_numbers = #tpu.dot_dimension_numbers<[2], [2], [1], [1], [0, 0, 0, 1, 1, 1], [0], [0]>} : vector<1x8x16xbf16>, vector<1x8x16xbf16>, vector<1x8x8xf32> -> vector<1x8x8xf32>
    %cst_89 = arith.constant dense<0.000000e+00> : vector<1x8x8xf32>
    %96 = tpu.matmul %91, %92, %cst_89 {dimension_numbers = #tpu.dot_dimension_numbers<[2], [2], [1], [1], [0, 0, 0, 1, 1, 1], [0], [0]>} : vector<1x8x16xbf16>, vector<1x8x16xbf16>, vector<1x8x8xf32> -> vector<1x8x8xf32>
    "tpu.trace_stop"() : () -> ()
    %97 = arith.addf %95, %96 : vector<1x8x8xf32>
    "tpu.trace_start"() <{level = 10 : i32, message = "bqd,bkd->bqk"}> : () -> ()
    %cst_90 = arith.constant dense<0.000000e+00> : vector<1x8x8xf32>
    %98 = tpu.matmul %93, %94, %cst_90 {dimension_numbers = #tpu.dot_dimension_numbers<[2], [2], [1], [1], [0, 0, 0, 1, 1, 1], [0], [0]>} : vector<1x8x16xbf16>, vector<1x8x16xbf16>, vector<1x8x8xf32> -> vector<1x8x8xf32>
    "tpu.trace_stop"() : () -> ()
    %99 = arith.addf %97, %98 : vector<1x8x8xf32>
    %100 = arith.addf %99, %85 : vector<1x8x8xf32>
    %cst_91 = arith.constant dense<0xFF800000> : vector<1x8xf32>
    %101 = vector.multi_reduction <maximumf>, %100, %cst_91 [2] : vector<1x8x8xf32> to vector<1x8xf32>
    %102 = vector.shape_cast %101 : vector<1x8xf32> to vector<1x8x1xf32>
    %103 = vector.broadcast %102 : vector<1x8x1xf32> to vector<1x8x8xf32>
    %104 = arith.subf %100, %103 : vector<1x8x8xf32>
    %105 = math.exp %104 : vector<1x8x8xf32>
    %cst_92 = arith.constant dense<0.000000e+00> : vector<1x8xf32>
    %106 = vector.multi_reduction <add>, %105, %cst_92 [2] : vector<1x8x8xf32> to vector<1x8xf32>
    %107 = vector.shape_cast %106 : vector<1x8xf32> to vector<1x8x1xf32>
    %108 = tpu.reciprocal %107 {approx = true} : vector<1x8x1xf32> -> vector<1x8x1xf32>
    %109 = vector.broadcast %108 : vector<1x8x1xf32> to vector<1x8x8xf32>
    %110 = arith.mulf %105, %109 : vector<1x8x8xf32>
    %111 = arith.truncf %110 : vector<1x8x8xf32> to vector<1x8x8xbf16>
    "tpu.trace_start"() <{level = 10 : i32, message = "bqk,bkd->bqd"}> : () -> ()
    %cst_93 = arith.constant dense<0.000000e+00> : vector<1x8x16xf32>
    %112 = tpu.matmul %111, %90, %cst_93 {dimension_numbers = #tpu.dot_dimension_numbers<[2], [1], [1], [2], [0, 0, 0, 1, 1, 2], [0], [0]>} : vector<1x8x8xbf16>, vector<1x8x16xbf16>, vector<1x8x16xf32> -> vector<1x8x16xf32>
    "tpu.trace_stop"() : () -> ()
    %c0_94 = arith.constant 0 : index
    %c0_95 = arith.constant 0 : index
    %c0_96 = arith.constant 0 : index
    %113 = vector.load %arg31[%c0_94, %c0_95, %c0_96] : memref<1x8x32xf32, #tpu.memory_space<vmem>>, vector<1x8x32xf32>
    %114 = arith.truncf %112 : vector<1x8x16xf32> to vector<1x8x16xbf16>
    %c0_97 = arith.constant 0 : index
    %c0_98 = arith.constant 0 : index
    %c0_99 = arith.constant 0 : index
    %115 = vector.load %arg16[%c0_97, %c0_98, %c0_99] : memref<1x32x32xbf16, #tpu.memory_space<vmem>>, vector<1x16x32xbf16>
    %116 = vector.shape_cast %115 : vector<1x16x32xbf16> to vector<16x32xbf16>
    %cst_100 = arith.constant dense<0.000000e+00> : vector<1x8x32xf32>
    %117 = tpu.matmul %114, %116, %cst_100 {dimension_numbers = #tpu.dot_dimension_numbers<[2], [0], [0, 1], [1], [0, 0, 0, 1, 1, 1], [], []>} : vector<1x8x16xbf16>, vector<16x32xbf16>, vector<1x8x32xf32> -> vector<1x8x32xf32>
    %118 = arith.addf %113, %117 : vector<1x8x32xf32>
    %c0_101 = arith.constant 0 : index
    %c0_102 = arith.constant 0 : index
    %c0_103 = arith.constant 0 : index
    %119 = vector.load %arg31[%c0_101, %c0_102, %c0_103] : memref<1x8x32xf32, #tpu.memory_space<vmem>>, vector<1x8x32xf32>
    tpu.vector_store %arg31[%c0_101, %c0_102, %c0_103], %118 {strides = array<i32>} : memref<1x8x32xf32, #tpu.memory_space<vmem>>, vector<1x8x32xf32>,
    %c0_104 = arith.constant 0 : index
    %c0_105 = arith.constant 0 : index
    %c16 = arith.constant 16 : index
    %120 = vector.load %arg27[%c0_104, %c0_105, %c16] : memref<1x8x32xbf16, #tpu.memory_space<vmem>>, vector<1x8x16xbf16>
    %c0_106 = arith.constant 0 : index
    %c0_107 = arith.constant 0 : index
    %c16_108 = arith.constant 16 : index
    %121 = vector.load %arg28[%c0_106, %c0_107, %c16_108] : memref<1x8x64xbf16, #tpu.memory_space<vmem>>, vector<1x8x16xbf16>
    %c0_109 = arith.constant 0 : index
    %c0_110 = arith.constant 0 : index
    %c48 = arith.constant 48 : index
    %122 = vector.load %arg28[%c0_109, %c0_110, %c48] : memref<1x8x64xbf16, #tpu.memory_space<vmem>>, vector<1x8x16xbf16>
    %c0_111 = arith.constant 0 : index
    %c0_112 = arith.constant 0 : index
    %c16_113 = arith.constant 16 : index
    %123 = vector.load %arg29[%c0_111, %c0_112, %c16_113] : memref<1x8x64xbf16, #tpu.memory_space<vmem>>, vector<1x8x16xbf16>
    %c0_114 = arith.constant 0 : index
    %c0_115 = arith.constant 0 : index
    %c48_116 = arith.constant 48 : index
    %124 = vector.load %arg29[%c0_114, %c0_115, %c48_116] : memref<1x8x64xbf16, #tpu.memory_space<vmem>>, vector<1x8x16xbf16>
    %c0_117 = arith.constant 0 : index
    %c0_118 = arith.constant 0 : index
    %c16_119 = arith.constant 16 : index
    %125 = vector.load %arg30[%c0_117, %c0_118, %c16_119] : memref<1x8x64xbf16, #tpu.memory_space<vmem>>, vector<1x8x16xbf16>
    %c0_120 = arith.constant 0 : index
    %c0_121 = arith.constant 0 : index
    %c48_122 = arith.constant 48 : index
    %126 = vector.load %arg30[%c0_120, %c0_121, %c48_122] : memref<1x8x64xbf16, #tpu.memory_space<vmem>>, vector<1x8x16xbf16>
    "tpu.trace_start"() <{level = 10 : i32, message = "bqd,bkd->bqk"}> : () -> ()
    %cst_123 = arith.constant dense<0.000000e+00> : vector<1x8x8xf32>
    %127 = tpu.matmul %120, %121, %cst_123 {dimension_numbers = #tpu.dot_dimension_numbers<[2], [2], [1], [1], [0, 0, 0, 1, 1, 1], [0], [0]>} : vector<1x8x16xbf16>, vector<1x8x16xbf16>, vector<1x8x8xf32> -> vector<1x8x8xf32>
    %cst_124 = arith.constant dense<0.000000e+00> : vector<1x8x8xf32>
    %128 = tpu.matmul %123, %124, %cst_124 {dimension_numbers = #tpu.dot_dimension_numbers<[2], [2], [1], [1], [0, 0, 0, 1, 1, 1], [0], [0]>} : vector<1x8x16xbf16>, vector<1x8x16xbf16>, vector<1x8x8xf32> -> vector<1x8x8xf32>
    "tpu.trace_stop"() : () -> ()
    %129 = arith.addf %127, %128 : vector<1x8x8xf32>
    "tpu.trace_start"() <{level = 10 : i32, message = "bqd,bkd->bqk"}> : () -> ()
    %cst_125 = arith.constant dense<0.000000e+00> : vector<1x8x8xf32>
    %130 = tpu.matmul %125, %126, %cst_125 {dimension_numbers = #tpu.dot_dimension_numbers<[2], [2], [1], [1], [0, 0, 0, 1, 1, 1], [0], [0]>} : vector<1x8x16xbf16>, vector<1x8x16xbf16>, vector<1x8x8xf32> -> vector<1x8x8xf32>
    "tpu.trace_stop"() : () -> ()
    %131 = arith.addf %129, %130 : vector<1x8x8xf32>
    %132 = arith.addf %131, %85 : vector<1x8x8xf32>
    %cst_126 = arith.constant dense<0xFF800000> : vector<1x8xf32>
    %133 = vector.multi_reduction <maximumf>, %132, %cst_126 [2] : vector<1x8x8xf32> to vector<1x8xf32>
    %134 = vector.shape_cast %133 : vector<1x8xf32> to vector<1x8x1xf32>
    %135 = vector.broadcast %134 : vector<1x8x1xf32> to vector<1x8x8xf32>
    %136 = arith.subf %132, %135 : vector<1x8x8xf32>
    %137 = math.exp %136 : vector<1x8x8xf32>
    %cst_127 = arith.constant dense<0.000000e+00> : vector<1x8xf32>
    %138 = vector.multi_reduction <add>, %137, %cst_127 [2] : vector<1x8x8xf32> to vector<1x8xf32>
    %139 = vector.shape_cast %138 : vector<1x8xf32> to vector<1x8x1xf32>
    %140 = tpu.reciprocal %139 {approx = true} : vector<1x8x1xf32> -> vector<1x8x1xf32>
    %141 = vector.broadcast %140 : vector<1x8x1xf32> to vector<1x8x8xf32>
    %142 = arith.mulf %137, %141 : vector<1x8x8xf32>
    %143 = arith.truncf %142 : vector<1x8x8xf32> to vector<1x8x8xbf16>
    "tpu.trace_start"() <{level = 10 : i32, message = "bqk,bkd->bqd"}> : () -> ()
    %cst_128 = arith.constant dense<0.000000e+00> : vector<1x8x16xf32>
    %144 = tpu.matmul %143, %122, %cst_128 {dimension_numbers = #tpu.dot_dimension_numbers<[2], [1], [1], [2], [0, 0, 0, 1, 1, 2], [0], [0]>} : vector<1x8x8xbf16>, vector<1x8x16xbf16>, vector<1x8x16xf32> -> vector<1x8x16xf32>
    "tpu.trace_stop"() : () -> ()
    %c0_129 = arith.constant 0 : index
    %c0_130 = arith.constant 0 : index
    %c0_131 = arith.constant 0 : index
    %145 = vector.load %arg31[%c0_129, %c0_130, %c0_131] : memref<1x8x32xf32, #tpu.memory_space<vmem>>, vector<1x8x32xf32>
    %146 = arith.truncf %144 : vector<1x8x16xf32> to vector<1x8x16xbf16>
    %c0_132 = arith.constant 0 : index
    %c16_133 = arith.constant 16 : index
    %c0_134 = arith.constant 0 : index
    %147 = vector.load %arg16[%c0_132, %c16_133, %c0_134] : memref<1x32x32xbf16, #tpu.memory_space<vmem>>, vector<1x16x32xbf16>
    %148 = vector.shape_cast %147 : vector<1x16x32xbf16> to vector<16x32xbf16>
    %cst_135 = arith.constant dense<0.000000e+00> : vector<1x8x32xf32>
    %149 = tpu.matmul %146, %148, %cst_135 {dimension_numbers = #tpu.dot_dimension_numbers<[2], [0], [0, 1], [1], [0, 0, 0, 1, 1, 1], [], []>} : vector<1x8x16xbf16>, vector<16x32xbf16>, vector<1x8x32xf32> -> vector<1x8x32xf32>
    %150 = arith.addf %145, %149 : vector<1x8x32xf32>
    %c0_136 = arith.constant 0 : index
    %c0_137 = arith.constant 0 : index
    %c0_138 = arith.constant 0 : index
    %151 = vector.load %arg31[%c0_136, %c0_137, %c0_138] : memref<1x8x32xf32, #tpu.memory_space<vmem>>, vector<1x8x32xf32>
    tpu.vector_store %arg31[%c0_136, %c0_137, %c0_138], %150 {strides = array<i32>} : memref<1x8x32xf32, #tpu.memory_space<vmem>>, vector<1x8x32xf32>,
    %c0_139 = arith.constant 0 : index
    %c0_140 = arith.constant 0 : index
    %c0_141 = arith.constant 0 : index
    %152 = vector.load %arg31[%c0_139, %c0_140, %c0_141] : memref<1x8x32xf32, #tpu.memory_space<vmem>>, vector<1x8x32xf32>
    %c0_142 = arith.constant 0 : index
    %c0_143 = arith.constant 0 : index
    %c0_144 = arith.constant 0 : index
    %153 = vector.load %arg17[%c0_142, %c0_143, %c0_144] : memref<1x1x32xf32, #tpu.memory_space<vmem>>, vector<1x1x32xf32>
    %154 = vector.shape_cast %153 : vector<1x1x32xf32> to vector<1x32xf32>
    %155 = vector.shape_cast %154 : vector<1x32xf32> to vector<1x1x32xf32>
    %156 = vector.broadcast %155 : vector<1x1x32xf32> to vector<1x8x32xf32>
    %157 = arith.addf %152, %156 : vector<1x8x32xf32>
    %158 = arith.addf %157, %32 : vector<1x8x32xf32>
    %c0_145 = arith.constant 0 : index
    %c0_146 = arith.constant 0 : index
    %c0_147 = arith.constant 0 : index
    %159 = vector.load %arg18[%c0_145, %c0_146, %c0_147] : memref<1x1x32xf32, #tpu.memory_space<vmem>>, vector<1x1x32xf32>
    %160 = vector.shape_cast %159 : vector<1x1x32xf32> to vector<1x32xf32>
    %c0_148 = arith.constant 0 : index
    %c0_149 = arith.constant 0 : index
    %c0_150 = arith.constant 0 : index
    %161 = vector.load %arg19[%c0_148, %c0_149, %c0_150] : memref<1x1x32xf32, #tpu.memory_space<vmem>>, vector<1x1x32xf32>
    %162 = vector.shape_cast %161 : vector<1x1x32xf32> to vector<1x32xf32>
    %cst_151 = arith.constant dense<0.000000e+00> : vector<1x8xf32>
    %163 = vector.multi_reduction <add>, %158, %cst_151 [2] : vector<1x8x32xf32> to vector<1x8xf32>
    %164 = vector.shape_cast %163 : vector<1x8xf32> to vector<1x8x1xf32>
    %cst_152 = arith.constant 3.200000e+01 : f32
    %165 = vector.broadcast %cst_152 : f32 to vector<1x8x1xf32>
    %166 = arith.divf %164, %165 : vector<1x8x1xf32>
    %167 = vector.broadcast %166 : vector<1x8x1xf32> to vector<1x8x32xf32>
    %168 = arith.subf %158, %167 : vector<1x8x32xf32>
    %169 = arith.mulf %168, %168 : vector<1x8x32xf32>
    %cst_153 = arith.constant dense<0.000000e+00> : vector<1x8xf32>
    %170 = vector.multi_reduction <add>, %169, %cst_153 [2] : vector<1x8x32xf32> to vector<1x8xf32>
    %171 = vector.shape_cast %170 : vector<1x8xf32> to vector<1x8x1xf32>
    %cst_154 = arith.constant 3.200000e+01 : f32
    %172 = vector.broadcast %cst_154 : f32 to vector<1x8x1xf32>
    %173 = arith.divf %171, %172 : vector<1x8x1xf32>
    %174 = vector.broadcast %166 : vector<1x8x1xf32> to vector<1x8x32xf32>
    %175 = arith.subf %158, %174 : vector<1x8x32xf32>
    %cst_155 = arith.constant 9.99999993E-9 : f32
    %176 = vector.broadcast %cst_155 : f32 to vector<1x8x1xf32>
    %177 = arith.addf %173, %176 : vector<1x8x1xf32>
    %178 = math.rsqrt %177 : vector<1x8x1xf32>
    %179 = vector.broadcast %178 : vector<1x8x1xf32> to vector<1x8x32xf32>
    %180 = arith.mulf %175, %179 : vector<1x8x32xf32>
    %181 = vector.shape_cast %160 : vector<1x32xf32> to vector<1x1x32xf32>
    %182 = vector.broadcast %181 : vector<1x1x32xf32> to vector<1x8x32xf32>
    %183 = arith.mulf %180, %182 : vector<1x8x32xf32>
    %184 = vector.shape_cast %162 : vector<1x32xf32> to vector<1x1x32xf32>
    %185 = vector.broadcast %184 : vector<1x1x32xf32> to vector<1x8x32xf32>
    %186 = arith.addf %183, %185 : vector<1x8x32xf32>
    %187 = arith.truncf %186 : vector<1x8x32xf32> to vector<1x8x32xbf16>
    %c0_156 = arith.constant 0 : index
    %c0_157 = arith.constant 0 : index
    %c0_158 = arith.constant 0 : index
    %188 = vector.load %arg20[%c0_156, %c0_157, %c0_158] : memref<1x32x32xbf16, #tpu.memory_space<vmem>>, vector<1x32x32xbf16>
    %189 = vector.shape_cast %188 : vector<1x32x32xbf16> to vector<32x32xbf16>
    %cst_159 = arith.constant dense<0.000000e+00> : vector<1x8x32xf32>
    %190 = tpu.matmul %187, %189, %cst_159 {dimension_numbers = #tpu.dot_dimension_numbers<[2], [0], [0, 1], [1], [0, 0, 0, 1, 1, 1], [], []>} : vector<1x8x32xbf16>, vector<32x32xbf16>, vector<1x8x32xf32> -> vector<1x8x32xf32>
    %c0_160 = arith.constant 0 : index
    %c0_161 = arith.constant 0 : index
    %c0_162 = arith.constant 0 : index
    %191 = vector.load %arg21[%c0_160, %c0_161, %c0_162] : memref<1x1x32xf32, #tpu.memory_space<vmem>>, vector<1x1x32xf32>
    %192 = vector.shape_cast %191 : vector<1x1x32xf32> to vector<1x32xf32>
    %193 = vector.shape_cast %192 : vector<1x32xf32> to vector<1x1x32xf32>
    %194 = vector.broadcast %193 : vector<1x1x32xf32> to vector<1x8x32xf32>
    %195 = arith.addf %190, %194 : vector<1x8x32xf32>
    %cst_163 = arith.constant 0.000000e+00 : f32
    %196 = vector.broadcast %cst_163 : f32 to vector<1x8x32xf32>
    %197 = arith.maximumf %195, %196 : vector<1x8x32xf32>
    %198 = arith.truncf %197 : vector<1x8x32xf32> to vector<1x8x32xbf16>
    %c0_164 = arith.constant 0 : index
    %c0_165 = arith.constant 0 : index
    %c0_166 = arith.constant 0 : index
    %199 = vector.load %arg22[%c0_164, %c0_165, %c0_166] : memref<1x32x32xbf16, #tpu.memory_space<vmem>>, vector<1x32x32xbf16>
    %200 = vector.shape_cast %199 : vector<1x32x32xbf16> to vector<32x32xbf16>
    %cst_167 = arith.constant dense<0.000000e+00> : vector<1x8x32xf32>
    %201 = tpu.matmul %198, %200, %cst_167 {dimension_numbers = #tpu.dot_dimension_numbers<[2], [0], [0, 1], [1], [0, 0, 0, 1, 1, 1], [], []>} : vector<1x8x32xbf16>, vector<32x32xbf16>, vector<1x8x32xf32> -> vector<1x8x32xf32>
    %c0_168 = arith.constant 0 : index
    %c0_169 = arith.constant 0 : index
    %c0_170 = arith.constant 0 : index
    %202 = vector.load %arg23[%c0_168, %c0_169, %c0_170] : memref<1x1x32xf32, #tpu.memory_space<vmem>>, vector<1x1x32xf32>
    %203 = vector.shape_cast %202 : vector<1x1x32xf32> to vector<1x32xf32>
    %204 = vector.shape_cast %203 : vector<1x32xf32> to vector<1x1x32xf32>
    %205 = vector.broadcast %204 : vector<1x1x32xf32> to vector<1x8x32xf32>
    %206 = arith.addf %201, %205 : vector<1x8x32xf32>
    %207 = arith.addf %206, %186 : vector<1x8x32xf32>
    %208 = vector.broadcast %0 : vector<1x8x1xf32> to vector<1x8x32xf32>
    %209 = arith.mulf %207, %208 : vector<1x8x32xf32>
    %c0_171 = arith.constant 0 : index
    %c0_172 = arith.constant 0 : index
    %c0_173 = arith.constant 0 : index
    %210 = vector.load %arg26[%c0_171, %c0_172, %c0_173] : memref<1x8x32xf32, #tpu.memory_space<vmem>>, vector<1x8x32xf32>
    tpu.vector_store %arg26[%c0_171, %c0_172, %c0_173], %209 {strides = array<i32>} : memref<1x8x32xf32, #tpu.memory_space<vmem>>, vector<1x8x32xf32>,
    %c1_i32 = arith.constant 1 : i32
    %211 = arith.cmpi eq, %arg1, %c1_i32 : i32
    %212 = arith.extui %211 : i1 to i32
    %c0_i32_174 = arith.constant 0 : i32
    %213 = arith.cmpi ne, %212, %c0_i32_174 : i32
    scf.if %213 {
      %c0_175 = arith.constant 0 : index
      %c0_176 = arith.constant 0 : index
      %214 = vector.load %arg24[%c0_175, %c0_176] : memref<1x32xf32, #tpu.memory_space<vmem>>, vector<1x32xf32>
      %c0_177 = arith.constant 0 : index
      %c0_178 = arith.constant 0 : index
      %215 = vector.load %arg25[%c0_177, %c0_178] : memref<1x32xf32, #tpu.memory_space<vmem>>, vector<1x32xf32>
      %cst_179 = arith.constant dense<0.000000e+00> : vector<1x8xf32>
      %216 = vector.multi_reduction <add>, %209, %cst_179 [2] : vector<1x8x32xf32> to vector<1x8xf32>
      %217 = vector.shape_cast %216 : vector<1x8xf32> to vector<1x8x1xf32>
      %cst_180 = arith.constant 3.200000e+01 : f32
      %218 = vector.broadcast %cst_180 : f32 to vector<1x8x1xf32>
      %219 = arith.divf %217, %218 : vector<1x8x1xf32>
      %220 = vector.broadcast %219 : vector<1x8x1xf32> to vector<1x8x32xf32>
      %221 = arith.subf %209, %220 : vector<1x8x32xf32>
      %222 = arith.mulf %221, %221 : vector<1x8x32xf32>
      %cst_181 = arith.constant dense<0.000000e+00> : vector<1x8xf32>
      %223 = vector.multi_reduction <add>, %222, %cst_181 [2] : vector<1x8x32xf32> to vector<1x8xf32>
      %224 = vector.shape_cast %223 : vector<1x8xf32> to vector<1x8x1xf32>
      %cst_182 = arith.constant 3.200000e+01 : f32
      %225 = vector.broadcast %cst_182 : f32 to vector<1x8x1xf32>
      %226 = arith.divf %224, %225 : vector<1x8x1xf32>
      %227 = vector.broadcast %219 : vector<1x8x1xf32> to vector<1x8x32xf32>
      %228 = arith.subf %209, %227 : vector<1x8x32xf32>
      %cst_183 = arith.constant 9.99999993E-9 : f32
      %229 = vector.broadcast %cst_183 : f32 to vector<1x8x1xf32>
      %230 = arith.addf %226, %229 : vector<1x8x1xf32>
      %231 = math.rsqrt %230 : vector<1x8x1xf32>
      %232 = vector.broadcast %231 : vector<1x8x1xf32> to vector<1x8x32xf32>
      %233 = arith.mulf %228, %232 : vector<1x8x32xf32>
      %234 = vector.shape_cast %214 : vector<1x32xf32> to vector<1x1x32xf32>
      %235 = vector.broadcast %234 : vector<1x1x32xf32> to vector<1x8x32xf32>
      %236 = arith.mulf %233, %235 : vector<1x8x32xf32>
      %237 = vector.shape_cast %215 : vector<1x32xf32> to vector<1x1x32xf32>
      %238 = vector.broadcast %237 : vector<1x1x32xf32> to vector<1x8x32xf32>
      %239 = arith.addf %236, %238 : vector<1x8x32xf32>
      %c0_184 = arith.constant 0 : index
      %c0_185 = arith.constant 0 : index
      %c0_186 = arith.constant 0 : index
      %240 = vector.load %arg26[%c0_184, %c0_185, %c0_186] : memref<1x8x32xf32, #tpu.memory_space<vmem>>, vector<1x8x32xf32>
      tpu.vector_store %arg26[%c0_184, %c0_185, %c0_186], %239 {strides = array<i32>} : memref<1x8x32xf32, #tpu.memory_space<vmem>>, vector<1x8x32xf32>,
    } else {
    }
    return
  }
  func.func @transform_0(%arg0: i32, %arg1: i32) -> (i32, i32, i32) {
    %c0_i32 = arith.constant 0 : i32
    %c0_i32_0 = arith.constant 0 : i32
    %c0_i32_1 = arith.constant 0 : i32
    return %arg0, %c0_i32, %c0_i32_0 : i32, i32, i32
  }
  func.func @transform_1(%arg0: i32, %arg1: i32) -> (i32, i32, i32) {
    %c0_i32 = arith.constant 0 : i32
    %c0_i32_0 = arith.constant 0 : i32
    %c0_i32_1 = arith.constant 0 : i32
    return %arg0, %c0_i32, %c0_i32_0 : i32, i32, i32
  }
  func.func @transform_2(%arg0: i32, %arg1: i32) -> (i32, i32, i32) {
    %c0_i32 = arith.constant 0 : i32
    %c0_i32_0 = arith.constant 0 : i32
    %c0_i32_1 = arith.constant 0 : i32
    return %arg0, %c0_i32, %c0_i32_0 : i32, i32, i32
  }
  func.func @transform_3(%arg0: i32, %arg1: i32) -> (i32, i32, i32) {
    %c0_i32 = arith.constant 0 : i32
    %c0_i32_0 = arith.constant 0 : i32
    %c0_i32_1 = arith.constant 0 : i32
    return %arg0, %c0_i32, %c0_i32_0 : i32, i32, i32
  }
  func.func @transform_4(%arg0: i32, %arg1: i32) -> (i32, i32, i32) {
    %c0_i32 = arith.constant 0 : i32
    %c0_i32_0 = arith.constant 0 : i32
    %c0_i32_1 = arith.constant 0 : i32
    return %arg1, %c0_i32, %c0_i32_0 : i32, i32, i32
  }
  func.func @transform_5(%arg0: i32, %arg1: i32) -> (i32, i32, i32) {
    %c0_i32 = arith.constant 0 : i32
    %c0_i32_0 = arith.constant 0 : i32
    %c0_i32_1 = arith.constant 0 : i32
    return %arg1, %c0_i32, %c0_i32_0 : i32, i32, i32
  }
  func.func @transform_6(%arg0: i32, %arg1: i32) -> (i32, i32, i32) {
    %c0_i32 = arith.constant 0 : i32
    %c0_i32_0 = arith.constant 0 : i32
    %c0_i32_1 = arith.constant 0 : i32
    return %arg1, %c0_i32, %c0_i32_0 : i32, i32, i32
  }
  func.func @transform_7(%arg0: i32, %arg1: i32) -> (i32, i32, i32) {
    %c0_i32 = arith.constant 0 : i32
    %c0_i32_0 = arith.constant 0 : i32
    %c0_i32_1 = arith.constant 0 : i32
    return %arg1, %c0_i32, %c0_i32_0 : i32, i32, i32
  }
  func.func @transform_8(%arg0: i32, %arg1: i32) -> (i32, i32, i32) {
    %c0_i32 = arith.constant 0 : i32
    %c0_i32_0 = arith.constant 0 : i32
    %c0_i32_1 = arith.constant 0 : i32
    return %arg1, %c0_i32, %c0_i32_0 : i32, i32, i32
  }
  func.func @transform_9(%arg0: i32, %arg1: i32) -> (i32, i32, i32) {
    %c0_i32 = arith.constant 0 : i32
    %c0_i32_0 = arith.constant 0 : i32
    %c0_i32_1 = arith.constant 0 : i32
    return %arg1, %c0_i32, %c0_i32_0 : i32, i32, i32
  }
  func.func @transform_10(%arg0: i32, %arg1: i32) -> (i32, i32, i32) {
    %c0_i32 = arith.constant 0 : i32
    %c0_i32_0 = arith.constant 0 : i32
    %c0_i32_1 = arith.constant 0 : i32
    return %arg1, %c0_i32, %c0_i32_0 : i32, i32, i32
  }
  func.func @transform_11(%arg0: i32, %arg1: i32) -> (i32, i32, i32) {
    %c0_i32 = arith.constant 0 : i32
    %c0_i32_0 = arith.constant 0 : i32
    %c0_i32_1 = arith.constant 0 : i32
    return %arg1, %c0_i32, %c0_i32_0 : i32, i32, i32
  }
  func.func @transform_12(%arg0: i32, %arg1: i32) -> (i32, i32, i32) {
    %c0_i32 = arith.constant 0 : i32
    %c0_i32_0 = arith.constant 0 : i32
    %c0_i32_1 = arith.constant 0 : i32
    return %arg1, %c0_i32, %c0_i32_0 : i32, i32, i32
  }
  func.func @transform_13(%arg0: i32, %arg1: i32) -> (i32, i32, i32) {
    %c0_i32 = arith.constant 0 : i32
    %c0_i32_0 = arith.constant 0 : i32
    %c0_i32_1 = arith.constant 0 : i32
    return %arg1, %c0_i32, %c0_i32_0 : i32, i32, i32
  }
  func.func @transform_14(%arg0: i32, %arg1: i32) -> (i32, i32, i32) {
    %c0_i32 = arith.constant 0 : i32
    %c0_i32_0 = arith.constant 0 : i32
    %c0_i32_1 = arith.constant 0 : i32
    return %arg1, %c0_i32, %c0_i32_0 : i32, i32, i32
  }
  func.func @transform_15(%arg0: i32, %arg1: i32) -> (i32, i32, i32) {
    %c0_i32 = arith.constant 0 : i32
    %c0_i32_0 = arith.constant 0 : i32
    %c0_i32_1 = arith.constant 0 : i32
    return %arg1, %c0_i32, %c0_i32_0 : i32, i32, i32
  }
  func.func @transform_16(%arg0: i32, %arg1: i32) -> (i32, i32, i32) {
    %c0_i32 = arith.constant 0 : i32
    %c0_i32_0 = arith.constant 0 : i32
    %c0_i32_1 = arith.constant 0 : i32
    return %arg1, %c0_i32, %c0_i32_0 : i32, i32, i32
  }
  func.func @transform_17(%arg0: i32, %arg1: i32) -> (i32, i32, i32) {
    %c0_i32 = arith.constant 0 : i32
    %c0_i32_0 = arith.constant 0 : i32
    %c0_i32_1 = arith.constant 0 : i32
    return %arg1, %c0_i32, %c0_i32_0 : i32, i32, i32
  }
  func.func @transform_18(%arg0: i32, %arg1: i32) -> (i32, i32, i32) {
    %c0_i32 = arith.constant 0 : i32
    %c0_i32_0 = arith.constant 0 : i32
    %c0_i32_1 = arith.constant 0 : i32
    return %arg1, %c0_i32, %c0_i32_0 : i32, i32, i32
  }
  func.func @transform_19(%arg0: i32, %arg1: i32) -> (i32, i32, i32) {
    %c0_i32 = arith.constant 0 : i32
    %c0_i32_0 = arith.constant 0 : i32
    %c0_i32_1 = arith.constant 0 : i32
    return %arg1, %c0_i32, %c0_i32_0 : i32, i32, i32
  }
  func.func @transform_20(%arg0: i32, %arg1: i32) -> (i32, i32, i32) {
    %c0_i32 = arith.constant 0 : i32
    %c0_i32_0 = arith.constant 0 : i32
    %c0_i32_1 = arith.constant 0 : i32
    return %arg1, %c0_i32, %c0_i32_0 : i32, i32, i32
  }
  func.func @transform_21(%arg0: i32, %arg1: i32) -> (i32, i32, i32) {
    %c0_i32 = arith.constant 0 : i32
    %c0_i32_0 = arith.constant 0 : i32
    %c0_i32_1 = arith.constant 0 : i32
    return %arg1, %c0_i32, %c0_i32_0 : i32, i32, i32
  }
  func.func @transform_22(%arg0: i32, %arg1: i32) -> (i32, i32) {
    %c0_i32 = arith.constant 0 : i32
    %c0_i32_0 = arith.constant 0 : i32
    %c0_i32_1 = arith.constant 0 : i32
    return %c0_i32, %c0_i32_0 : i32, i32
  }
  func.func @transform_23(%arg0: i32, %arg1: i32) -> (i32, i32) {
    %c0_i32 = arith.constant 0 : i32
    %c0_i32_0 = arith.constant 0 : i32
    %c0_i32_1 = arith.constant 0 : i32
    return %c0_i32, %c0_i32_0 : i32, i32
  }
  func.func @transform_24(%arg0: i32, %arg1: i32) -> (i32, i32, i32) {
    %c0_i32 = arith.constant 0 : i32
    %c0_i32_0 = arith.constant 0 : i32
    %c0_i32_1 = arith.constant 0 : i32
    return %arg0, %c0_i32, %c0_i32_0 : i32, i32, i32
  }
}

</mosaic_0001>

<bundles_post_ra>
// kernel: tpu_custom_call.1
= control target key start
LH: loop header
LB: loop body
LE: loop exit
PB: predicated region body
PF: predicated region fallthrough
CT: control target
= control target key end

     0   :  { %s4297_s0 = inlined_call_operand.hbm [shape: f32[2,8,32], index: 0, kind: input, shape index: {}]   ;;  %s4298_s1 = inlined_call_operand.vmem [shape: f32[2,8,1], index: 1, kind: input, shape index: {}]   ;;  %s4299_s2 = inlined_call_operand.hbm [shape: f32[2,8,32], index: 2, kind: input, shape index: {}]   ;;  %s4300_s3 = inlined_call_operand.hbm [shape: f32[2,8,32], index: 3, kind: input, shape index: {}]   ;;  %s4301_s4 = inlined_call_operand.vmem [shape: f32[2,1,32], index: 4, kind: input, shape index: {}]   ;;  %s4302_s5 = inlined_call_operand.hbm [shape: f32[2,1,32], index: 5, kind: input, shape index: {}]   ;;  %s4303_s6 = inlined_call_operand.hbm [shape: bf16[2,32,32], index: 6, kind: input, shape index: {}]   ;;  %s4304_s7 = inlined_call_operand.hbm [shape: f32[2,1,32], index: 7, kind: input, shape index: {}]   ;;  %s4305_s8 = inlined_call_operand.hbm [shape: bf16[2,32,64], index: 8, kind: input, shape index: {}]   ;;  %s4306_s9 = inlined_call_operand.hbm [shape: f32[2,1,64], index: 9, kind: input, shape index: {}]   ;;  %s4307_s10 = inlined_call_operand.hbm [shape: bf16[2,32,64], index: 10, kind: input, shape index: {}]   ;;  %s4308_s11 = inlined_call_operand.hbm [shape: f32[2,1,64], index: 11, kind: input, shape index: {}]   ;;  %s4309_s12 = inlined_call_operand.hbm [shape: bf16[2,32,64], index: 12, kind: input, shape index: {}]   ;;  %s4310_s13 = inlined_call_operand.hbm [shape: f32[2,1,64], index: 13, kind: input, shape index: {}]   ;;  %s4311_s14 = inlined_call_operand.hbm [shape: bf16[2,32,32], index: 14, kind: input, shape index: {}]   ;;  %s4312_s15 = inlined_call_operand.hbm [shape: f32[2,1,32], index: 15, kind: input, shape index: {}]   ;;  %s4313_s16 = inlined_call_operand.hbm [shape: f32[2,1,32], index: 16, kind: input, shape index: {}]   ;;  %s4314_s17 = inlined_call_operand.hbm [shape: f32[2,1,32], index: 17, kind: input, shape index: {}]   ;;  %s4315_s18 = inlined_call_operand.vmem [shape: bf16[2,32,32], index: 18, kind: input, shape index: {}]   ;;  %s4316_s19 = inlined_call_operand.vmem [shape: f32[2,1,32], index: 19, kind: input, shape index: {}]   ;;  %s4317_s20 = inlined_call_operand.hbm [shape: bf16[2,32,32], index: 20, kind: input, shape index: {}]   ;;  %s4318_s21 = inlined_call_operand.vmem [shape: f32[2,1,32], index: 21, kind: input, shape index: {}]   ;;  %s4319_s22 = inlined_call_operand.vmem [shape: f32[1,32], index: 22, kind: input, shape index: {}]   ;;  %s4320_s23 = inlined_call_operand.vmem [shape: f32[1,32], index: 23, kind: input, shape index: {}]   ;;  %s4321_s24 = inlined_call_operand.hbm [shape: f32[2,8,32], index: 24, kind: output, shape index: {}]  }
   0x1   :  { %4349 = sst [smem:[#allocation60_spill]] %s4297_s0 }
   0x2   :  { %4350 = sst [smem:[#allocation61_spill]] %s4298_s1 }
   0x3   :  { %4351 = sst [smem:[#allocation62_spill]] %s4299_s2 }
   0x4   :  { %4352 = sst [smem:[#allocation63_spill]] %s4300_s3 }
   0x5   :  { %4353 = sst [smem:[#allocation64_spill]] %s4301_s4 }
   0x6   :  { %4354 = sst [smem:[#allocation65_spill]] %s4302_s5 }
   0x7   :  { %4355 = sst [smem:[#allocation66_spill]] %s4303_s6 }
   0x8   :  { %4356 = sst [smem:[#allocation67_spill]] %s4304_s7 }
   0x9   :  { %4357 = sst [smem:[#allocation68_spill]] %s4305_s8 }
   0xa   :  { %4358 = sst [smem:[#allocation69_spill]] %s4306_s9 }
   0xb   :  { %4359 = sst [smem:[#allocation70_spill]] %s4307_s10 }
   0xc   :  { %4360 = sst [smem:[#allocation71_spill]] %s4308_s11 }
   0xd   :  { %4361 = sst [smem:[#allocation72_spill]] %s4309_s12 }
   0xe   :  { %4362 = sst [smem:[#allocation73_spill]] %s4310_s13 }
   0xf   :  { %4363 = sst [smem:[#allocation74_spill]] %s4311_s14 }
  0x10   :  { %4364 = sst [smem:[#allocation75_spill]] %s4312_s15 }
  0x11   :  { %4365 = sst [smem:[#allocation76_spill]] %s4313_s16 }
  0x12   :  { %4366 = sst [smem:[#allocation77_spill]] %s4315_s18 }
  0x13   :  { %4367 = sst [smem:[#allocation78_spill]] %s4316_s19 }
  0x14   :  { %4368 = sst [smem:[#allocation79_spill]] %s4317_s20 }
  0x15   :  { %4369 = sst [smem:[#allocation80_spill]] %s4318_s21 }
  0x16   :  { %4370 = sst [smem:[#allocation81_spill]] %s4319_s22 }
  0x17   :  { %4371 = sst [smem:[#allocation82_spill]] %s4320_s23 }
  0x18   :  { %4372 = sst [smem:[#allocation83_spill]] %s4321_s24 }
  0x19   :  { %29 = vsyncpa [#allocation8], 0 }
  0x1a   :  { %31 = vsyncpa [#allocation8 + $0x1], 0 }
  0x1b   :  { %32 = vsyncpa [#allocation11], 0 }
  0x1c   :  { %34 = vsyncpa [#allocation11 + $0x1], 0 }
  0x1d   :  { %35 = vsyncpa [#allocation14], 0 }
  0x1e   :  { %37 = vsyncpa [#allocation14 + $0x1], 0 }
  0x1f   :  { %38 = vsyncpa [#allocation17], 0 }
  0x20   :  { %40 = vsyncpa [#allocation17 + $0x1], 0 }
  0x21   :  { %41 = vsyncpa [#allocation20], 0 }
  0x22   :  { %43 = vsyncpa [#allocation20 + $0x1], 0 }
  0x23   :  { %44 = vsyncpa [#allocation23], 0 }
  0x24   :  { %46 = vsyncpa [#allocation23 + $0x1], 0 }
  0x25   :  { %47 = vsyncpa [#allocation26], 0 }
  0x26   :  { %49 = vsyncpa [#allocation26 + $0x1], 0 }
  0x27   :  { %50 = vsyncpa [#allocation29], 0 }
  0x28   :  { %52 = vsyncpa [#allocation29 + $0x1], 0 }
  0x29   :  { %53 = vsyncpa [#allocation32], 0 }
  0x2a   :  { %55 = vsyncpa [#allocation32 + $0x1], 0 }
  0x2b   :  { %56 = vsyncpa [#allocation9], 0 }
  0x2c   :  { %58 = vsyncpa [#allocation9 + $0x1], 0  ;;  %s3640_s5 = smov 0   ;;  %s3642_s26 = smov 0  }
  0x2d   :  { %s3644_s27 = smov 0   ;;  %s3646_s28 = smov 0  }
  0x2e   :  { %s3648_s6 = smov 0   ;;  %s3650_s2 = smov 0  }
  0x2f   :  { %s3652_s29 = smov 0   ;;  %s3654_s0 = smov 0  }
  0x30   :  { %s3656_s7 = smov 0   ;;  %s3658_s30 = smov 0  }
  0x31   :  { %s3660_s3 = smov 0  }
  0x32 LB: > { %4373 = sst [smem:[#allocation45_spill]] %s3467_s26  ;;  %s3696_s25 = sadd.s32 4294967295, %s3503_s3   ;;  %s3503_s3 = sphi %s3660_s3, %s64_s3   ;;  %s3499_s30 = sphi %s3658_s30, %s4469_s30   ;;  %s3495_s7 = sphi %s3656_s7, %s4474_s7   ;;  %s3491_s0 = sphi %s3654_s0, %s4467_s0   ;;  %s3487_s29 = sphi %s3652_s29, %s4473_s29   ;;  %s3483_s2 = sphi %s3650_s2, %s4472_s2   ;;  %s3479_s6 = sphi %s3648_s6, %s4471_s6   ;;  %s3475_s28 = sphi %s3646_s28, %s4470_s28   ;;  %s3471_s27 = sphi %s3644_s27, %s4465_s27   ;;  %s3467_s26 = sphi %s3642_s26, %s4464_s26   ;;  %s3463_s5 = sphi %s3640_s5, %s4463_s5  }
  0x33   : > { %4374 = sst [smem:[#allocation46_spill]] %s3471_s27  ;;  %s2563_s8 = sadd.s32 4294967294, %s3503_s3  }
  0x34   : > { %4375 = sst [smem:[#allocation47_spill]] %s3475_s28  ;;  %s73_s4 = sadd.s32 1, %s3495_s7 }
  0x35   : > { %4376 = sst [smem:[#allocation48_spill]] %s3487_s29  ;;  %s76_s1 = sadd.s32 1, %s3499_s30 }
  0x36   : > { %4377 = sst [smem:[#allocation49_spill]] %s3491_s0  ;;  %p74_p0 = scmp.ge.s32.totalorder %s73_s4, 2 }
  0x37   : > { %4378 = sst [smem:[#allocation50_spill]] %s3499_s30  ;;  %s83_s24 = sadd.s32 1, %s3483_s2 }
  0x38   : > { %4379 = sst [smem:[#allocation51_spill]] %s3696_s25  ;;  %p90_p1 = scmp.ne.s32.totalorder %s3483_s2, %s3479_s6 }
  0x39   : > { %p91_p2 = scmp.eq.s32.totalorder %s3503_s3, 0  ;;  %s4476_s4 = smov (%p74_p0, %s73_s4), 0 }
  0x3a   : > { %4380 = sst [smem:[#allocation52_spill]] %s4476_s4  ;;  %s4478_s1 = smov (!%p74_p0, %s76_s1), %s3499_s30 }
  0x3b   : > { %p3713_p3 = por %p91_p2, %p90_p1  ;;  %p4326_p4 = scmp.ne.s32.totalorder %s3479_s6, %s3475_s28 }
  0x3c   : > { %p78_p5 = scmp.ge.s32.totalorder %s4478_s1, 2  ;;  %p97_p6 = scmp.eq.s32.totalorder %s3696_s25, 0 }
  0x3d   : > { %s210_s22 = ssub.s32 %s3495_s7, %s4476_s4  ;;  %s213_s21 = sadd.s32 1, %s3471_s27 }
  0x3e   : > { %s4480_s1 = smov (%p78_p5, %s4478_s1), 0  ;;  %p3730_p7 = por %p97_p6, %p4326_p4 }
  0x3f   : > { %4382 = sst [smem:[#allocation53_spill]] %s4480_s1  ;;  %p211_p8 = scmp.eq.s32.totalorder %s210_s22, 0 }
  0x40   : > { %s4383_s18 = scalar_select %p3730_p7, 1, 0 }
  0x41   : > { %s80_s19 = ssub.s32 %s3499_s30, %s4480_s1  ;;  %p220_p9 = scmp.ne.s32.totalorder %s3471_s27, %s3467_s26 }
  0x42   : > { %4384 = sst [smem:[#allocation54_spill]] %s4383_s18  ;;  %p81_p10 = scmp.eq.s32.totalorder %s80_s19, 0 }
  0x43   : > { %p226_p11 = scmp.ne.s32.totalorder %s3467_s26, %s3463_s5  ;;  %p3748_p12 = por %p220_p9, %p91_p2 }
  0x44   : > { %s3741_s29 = scalar_select %p211_p8, %s3471_s27, %s213_s21  }
  0x45   : > { %s3744_s4 = scalar_select %p81_p10, %s3483_s2, %s83_s24  }
  0x46   : > { %4385 = sst [smem:[#allocation55_spill]] %s3741_s29  ;;  %p3754_p13 = por %p226_p11, %p97_p6 }
  0x47   : > { %4386 = sst [smem:[#allocation56_spill]] %s3744_s4  ;;  %p708_p0 = scmp.eq.s32.totalorder %s3696_s25, 3 }
  0x48   : > { %s4388_s20 = scalar_select %p3754_p13, 1, 0 }
  0x49   : > { %p714_p5 = scmp.eq.s32.totalorder %s2563_s8, 3  ;;  %p3762_p4 = por %p708_p0, %p90_p1 }
  0x4a   : > { %4389 = sst [smem:[#allocation57_spill]] %s4388_s20  ;;  %p4392_p8 = scmp.ne.s32.totalorder %s3479_s6, %s3475_s28 }
  0x4b   : > { %s4390_s19 = scalar_select %p3762_p4, 1, 0 }
  0x4c   : > { %p3769_p10 = por %p714_p5, %p4392_p8  ;;  %p2565_p2 = scmp.ge.s32.totalorder %s3503_s3, 4 }
  0x4d   : > { %4391 = sst [smem:[#allocation58_spill]] %s4390_s19  ;;  %s4333_s22 = sand.u32 (!%p2565_p2), 1, %s3483_s2  }
  0x4e   : > { %s4393_s21 = scalar_select %p3769_p10, 1, 0 }
  0x4f   : > { %736 = sbr.rel (%p2565_p2) target bundleno = 156 (0x9c), region = 24  ;;  %s3776_s24 = sshll.u32 (!%p2565_p2), %s3499_s30, 3 }
  0x50   : > { %4394 = sst [smem:[#allocation59_spill]] %s4393_s21  ;;  %s3780_s5 = sshll.u32 (!%p2565_p2), %s4333_s22, 3 }
  0x51   : > { %s3783_s8 = sand.u32 (!%p2565_p2), 1, %s3503_s3   ;;  %s4395_s29 = sld [smem:[#allocation62_spill]] (!%p2565_p2) }
  0x52   : > { %s770_s28 = scalar_lea.vmem (!%p2565_p2), [#allocation10], %s3780_s5  ;;  %s4340_s22 = scalar_lea.sflag (!%p2565_p2), [#allocation11], %s3783_s8 }
  0x53   : > { %s778_s30 = sshll.u32 (!%p2565_p2), %s770_s28, 4  ;;  %s3796_s20 = sand.u32 (!%p2565_p2), 1, %s3471_s27   ;;  %s779_s30 = int_to_ptr.vmem [resolvable:$true] %s778_s30 }
  0x54   : > { %s4396_s26 = sld [smem:[#allocation65_spill]]  ;;  %s4347_s18 = scalar_lea.sflag [#allocation14], %s3783_s8 }
  0x55   : > { %s4397_s4 = sld [smem:[#allocation67_spill]] }
  0x56   : > { %s4398_s9 = sld [smem:[#allocation69_spill]] }
  0x57   : > { %s774_s21 = scalar_lea.hbm %s4395_s29, %s3776_s24  ;;  %s4399_s11 = sld [smem:[#allocation71_spill]] }
  0x58   : > { %s776_s19 = sshll.u32 %s774_s21, 4  ;;  %s813_s21 = scalar_lea.vmem [#allocation13], %s3796_s20  ;;  %s777_s19 = int_to_ptr.hbm [resolvable:$true] %s776_s19 }
  0x59   : > { %2704 = dma.hbm_to_vmem [thread:$0]  (%p3713_p3), %s777_s19, 128, %s779_s30, %s4340_s22  }
  0x5a   : > { %s816_s29 = scalar_lea.hbm %s4396_s26, %s3495_s7  ;;  %s820_s25 = sshll.u32 %s813_s21, 4  ;;  %s821_s25 = int_to_ptr.vmem [resolvable:$true] %s820_s25 }
  0x5b   : > { %s818_s28 = sshll.u32 %s816_s29, 4  ;;  %s855_s1 = scalar_lea.hbm %s4397_s4, %s3495_s7  ;;  %s819_s28 = int_to_ptr.hbm [resolvable:$true] %s818_s28 }
  0x5c   : > { %2706 = dma.hbm_to_vmem [thread:$0]  (%p3748_p12), %s819_s28, 16, %s821_s25, %s4347_s18  }
  0x5d   : > { %s857_s26 = sshll.u32 %s855_s1, 4  ;;  %s852_s22 = scalar_lea.vmem [#allocation16], %s3796_s20  ;;  %s858_s26 = int_to_ptr.hbm [resolvable:$true] %s857_s26 }
  0x5e   : > { %s859_s29 = sshll.u32 %s852_s22, 4  ;;  %s4342_s21 = scalar_lea.sflag [#allocation17], %s3783_s8  ;;  %s860_s29 = int_to_ptr.vmem [resolvable:$true] %s859_s29 }
  0x5f   : > { %2708 = dma.hbm_to_vmem [thread:$0]  (%p3748_p12), %s858_s26, 16, %s860_s29, %s4342_s21  }
  0x60   : > { %s894_s28 = scalar_lea.hbm %s4398_s9, %s3495_s7  ;;  %s891_s30 = scalar_lea.vmem [#allocation19], %s3796_s20 }
  0x61   : > { %s898_s19 = sshll.u32 %s891_s30, 4  ;;  %s896_s4 = sshll.u32 %s894_s28, 4  ;;  %s899_s19 = int_to_ptr.vmem [resolvable:$true] %s898_s19  ;;  %s897_s4 = int_to_ptr.hbm [resolvable:$true] %s896_s4 }
  0x62   : > { %s4343_s22 = scalar_lea.sflag [#allocation20], %s3783_s8  ;;  %s933_s27 = scalar_lea.hbm %s4399_s11, %s3495_s7 }
  0x63   : > { %2710 = dma.hbm_to_vmem [thread:$0]  (%p3748_p12), %s897_s4, 16, %s899_s19, %s4343_s22  }
  0x64   : > { %s935_s29 = sshll.u32 %s933_s27, 4  ;;  %s930_s25 = scalar_lea.vmem [#allocation22], %s3796_s20  ;;  %s936_s29 = int_to_ptr.hbm [resolvable:$true] %s935_s29 }
  0x65   : > { %s937_s21 = sshll.u32 %s930_s25, 4  ;;  %s4344_s28 = scalar_lea.sflag [#allocation23], %s3783_s8  ;;  %s938_s21 = int_to_ptr.vmem [resolvable:$true] %s937_s21 }
  0x66   : > { %2712 = dma.hbm_to_vmem [thread:$0]  (%p3748_p12), %s936_s29, 16, %s938_s21, %s4344_s28  }
  0x67   : > { %s4400_s13 = sld [smem:[#allocation73_spill]]  ;;  %s969_s1 = scalar_lea.vmem [#allocation25], %s3796_s20 }
  0x68   : > { %s976_s26 = sshll.u32 %s969_s1, 4  ;;  %s4345_s25 = scalar_lea.sflag [#allocation26], %s3783_s8  ;;  %s977_s26 = int_to_ptr.vmem [resolvable:$true] %s976_s26 }
  0x69   : > { %s4401_s15 = sld [smem:[#allocation75_spill]]  ;;  %s1008_s19 = scalar_lea.vmem [#allocation28], %s3796_s20 }
  0x6a   : > { %s1015_s28 = sshll.u32 %s1008_s19, 4  ;;  %s1045_s22 = scalar_lea.hbm %s4314_s17, %s3495_s7  ;;  %s1016_s28 = int_to_ptr.vmem [resolvable:$true] %s1015_s28 }
  0x6b   : > { %s4348_s19 = scalar_lea.sflag [#allocation32], %s3783_s8  ;;  %s4406_s11 = sld [smem:[#allocation66_spill]] }
  0x6c   : > { %s4409_s9 = scalar_lea.sflag [#allocation17], %s3783_s8  ;;  %s4410_s10 = sld [smem:[#allocation70_spill]] }
  0x6d   : > { %s972_s4 = scalar_lea.hbm %s4400_s13, %s3495_s7  ;;  %s4404_s13 = sld [smem:[#allocation63_spill]] }
  0x6e   : > { %s974_s27 = sshll.u32 %s972_s4, 4  ;;  %s4346_s4 = scalar_lea.sflag [#allocation29], %s3783_s8  ;;  %s975_s27 = int_to_ptr.hbm [resolvable:$true] %s974_s27 }
  0x6f   : > { %2714 = dma.hbm_to_vmem [thread:$0]  (%p3748_p12), %s975_s27, 16, %s977_s26, %s4345_s25  }
  0x70   : > { %s1011_s29 = scalar_lea.hbm %s4401_s15, %s3495_s7  ;;  %s1042_s27 = scalar_lea.vmem [#allocation31], %s3796_s20 }
  0x71   : > { %s1013_s30 = sshll.u32 %s1011_s29, 4  ;;  %s1049_s21 = sshll.u32 %s1042_s27, 4  ;;  %s1014_s30 = int_to_ptr.hbm [resolvable:$true] %s1013_s30  ;;  %s1050_s21 = int_to_ptr.vmem [resolvable:$true] %s1049_s21 }
  0x72   : > { %2716 = dma.hbm_to_vmem [thread:$0]  (%p3748_p12), %s1014_s30, 16, %s1016_s28, %s4346_s4  }
  0x73   : > { %s1047_s29 = sshll.u32 %s1045_s22, 4  ;;  %s4402_s30 = sld [smem:[#allocation60_spill]]  ;;  %s1048_s29 = int_to_ptr.hbm [resolvable:$true] %s1047_s29 }
  0x74   : > { %2718 = dma.hbm_to_vmem [thread:$0]  (%p3748_p12), %s1048_s29, 16, %s1050_s21, %s4348_s19  }
  0x75   : > { %s744_s4 = scalar_lea.vmem [#allocation7], %s3780_s5  ;;  %s4403_s22 = sand.u32 1, %s3483_s2  }
  0x76   : > { %s752_s18 = sshll.u32 %s744_s4, 4  ;;  %s741_s27 = scalar_lea.sflag [#allocation8], %s4403_s22  ;;  %s753_s18 = int_to_ptr.vmem [resolvable:$true] %s752_s18 }
  0x77   : > { %s793_s15 = scalar_lea.hbm %s4404_s13, %s3776_s24  ;;  %s789_s25 = scalar_lea.vmem [#allocation12], %s3780_s5 }
  0x78   : > { %s795_s21 = sshll.u32 %s793_s15, 4  ;;  %s797_s29 = sshll.u32 %s789_s25, 4  ;;  %s796_s21 = int_to_ptr.hbm [resolvable:$true] %s795_s21  ;;  %s798_s29 = int_to_ptr.vmem [resolvable:$true] %s797_s29 }
  0x79   : > { %s748_s1 = scalar_lea.hbm %s4402_s30, %s3776_s24  ;;  %s4405_s28 = scalar_lea.sflag [#allocation11], %s3783_s8 }
  0x7a   : > { %s750_s26 = sshll.u32 %s748_s1, 4  ;;  %s3887_s4 = sshll.u32 %s3796_s20, 4  ;;  %s751_s26 = int_to_ptr.hbm [resolvable:$true] %s750_s26 }
  0x7b   : > { %2703 = dma.hbm_to_vmem [thread:$0]  (%p3713_p3), %s751_s26, 128, %s753_s18, %s741_s27  }
  0x7c   : > { %2705 = dma.hbm_to_vmem [thread:$0]  (%p3713_p3), %s796_s21, 128, %s798_s29, %s4405_s28  }
  0x7d   : > { %s3890_s30 = sshll.u32 %s3495_s7, 4  ;;  %s831_s24 = scalar_lea.vmem [#allocation15], %s3887_s4 }
  0x7e   : > { %s836_s13 = scalar_lea.hbm %s4406_s11, %s3890_s30  ;;  %s839_s23 = sshll.u32 %s831_s24, 4  ;;  %s840_s23 = int_to_ptr.vmem [resolvable:$true] %s839_s23 }
  0x7f   : > { %s837_s15 = sshll.u32 %s836_s13, 4  ;;  %s3505_s5 = smov 64   ;;  %s838_s15 = int_to_ptr.hbm [resolvable:$true] %s837_s15 }
  0x80   : > { %s3506_s1 = smov 4   ;;  %s4407_s26 = scalar_lea.sflag [#allocation14], %s3783_s8 }
  0x81   : > { %2707 = dma.hbm_to_vmem [thread:$0]  (%p3748_p12), %s838_s15, 256, %s840_s23, %s4407_s26, %s3505_s5, %s3505_s5, %s3506_s1  }
  0x82   : > { %s4408_s21 = sld [smem:[#allocation68_spill]]  ;;  %s870_s28 = scalar_lea.vmem [#allocation18], %s3887_s4 }
  0x83   : > { %s878_s18 = sshll.u32 %s870_s28, 4  ;;  %s914_s15 = scalar_lea.hbm %s4410_s10, %s3890_s30  ;;  %s879_s18 = int_to_ptr.vmem [resolvable:$true] %s878_s18 }
  0x84   : > { %s915_s24 = sshll.u32 %s914_s15, 4  ;;  %s909_s23 = scalar_lea.vmem [#allocation21], %s3887_s4  ;;  %s916_s24 = int_to_ptr.hbm [resolvable:$true] %s915_s24 }
  0x85   : > { %s917_s26 = sshll.u32 %s909_s23, 4  ;;  %s4411_s22 = scalar_lea.sflag [#allocation20], %s3783_s8  ;;  %s918_s26 = int_to_ptr.vmem [resolvable:$true] %s917_s26 }
  0x86   : > { %2711 = dma.hbm_to_vmem [thread:$0]  (%p3748_p12), %s916_s24, 256, %s918_s26, %s4411_s22, %s3505_s5, %s3505_s5, %s3506_s1  }
  0x87   : > { %s4412_s12 = sld [smem:[#allocation72_spill]]  ;;  %s948_s28 = scalar_lea.vmem [#allocation24], %s3887_s4 }
  0x88   : > { %s875_s25 = scalar_lea.hbm %s4408_s21, %s3890_s30  ;;  %s4414_s14 = sld [smem:[#allocation74_spill]] }
  0x89   : > { %s876_s29 = sshll.u32 %s875_s25, 4  ;;  %s987_s23 = scalar_lea.vmem [#allocation27], %s3887_s4  ;;  %s877_s29 = int_to_ptr.hbm [resolvable:$true] %s876_s29 }
  0x8a   : > { %2709 = dma.hbm_to_vmem [thread:$0]  (%p3748_p12), %s877_s29, 256, %s879_s18, %s4409_s9, %s3505_s5, %s3505_s5, %s3506_s1  }
  0x8b   : > { %s956_s18 = sshll.u32 %s948_s28, 4  ;;  %s4413_s9 = scalar_lea.sflag [#allocation23], %s3783_s8  ;;  %s957_s18 = int_to_ptr.vmem [resolvable:$true] %s956_s18 }
  0x8c   : > { %s995_s26 = sshll.u32 %s987_s23, 4  ;;  %s4415_s22 = scalar_lea.sflag [#allocation26], %s3783_s8  ;;  %s996_s26 = int_to_ptr.vmem [resolvable:$true] %s995_s26 }
  0x8d   : > { %s953_s25 = scalar_lea.hbm %s4412_s12, %s3890_s30  ;;  %s4416_s16 = sld [smem:[#allocation76_spill]] }
  0x8e   : > { %s954_s29 = sshll.u32 %s953_s25, 4  ;;  %s992_s15 = scalar_lea.hbm %s4414_s14, %s3890_s30  ;;  %s955_s29 = int_to_ptr.hbm [resolvable:$true] %s954_s29 }
  0x8f   : > { %2713 = dma.hbm_to_vmem [thread:$0]  (%p3748_p12), %s955_s29, 256, %s957_s18, %s4413_s9, %s3505_s5, %s3505_s5, %s3506_s1  }
  0x90   : > { %s993_s24 = sshll.u32 %s992_s15, 4  ;;  %s1025_s28 = scalar_lea.vmem [#allocation30], %s3796_s20  ;;  %s994_s24 = int_to_ptr.hbm [resolvable:$true] %s993_s24 }
  0x91   : > { %2715 = dma.hbm_to_vmem [thread:$0]  (%p3748_p12), %s994_s24, 256, %s996_s26, %s4415_s22, %s3505_s5, %s3505_s5, %s3506_s1  }
  0x92   : > { %s1032_s18 = sshll.u32 %s1025_s28, 4  ;;  %s4417_s9 = scalar_lea.sflag [#allocation29], %s3783_s8  ;;  %s1033_s18 = int_to_ptr.vmem [resolvable:$true] %s1032_s18 }
  0x93   : > { %s1028_s25 = scalar_lea.hbm %s4416_s16, %s3495_s7  ;;  %s4418_s15 = sld [smem:[#allocation79_spill]] }
  0x94   : > { %s1030_s29 = sshll.u32 %s1028_s25, 4  ;;  %s1074_s10 = scalar_lea.vmem [#allocation33], %s3887_s4  ;;  %s1031_s29 = int_to_ptr.hbm [resolvable:$true] %s1030_s29 }
  0x95   : > { %2717 = dma.hbm_to_vmem [thread:$0]  (%p3748_p12), %s1031_s29, 16, %s1033_s18, %s4417_s9  }
  0x96   : > { %s1082_s12 = sshll.u32 %s1074_s10, 4  ;;  %s4419_s20 = scalar_lea.sflag [#allocation32], %s3783_s8  ;;  %s1083_s12 = int_to_ptr.vmem [resolvable:$true] %s1082_s12 }
  0x99   : > { %s1079_s23 = scalar_lea.hbm %s4418_s15, %s3890_s30 }
  0x9a   : > { %s1080_s19 = sshll.u32 %s1079_s23, 4  ;;  %s1081_s19 = int_to_ptr.hbm [resolvable:$true] %s1080_s19 }
  0x9b   : > { %2719 = dma.hbm_to_vmem [thread:$0]  (%p3748_p12), %s1081_s19, 256, %s1083_s12, %s4419_s20, %s3505_s5, %s3505_s5, %s3506_s1  }
  0x9c PF: > { %p2590_p1 = scmp.ge.s32.totalorder %s3503_s3, 1  ;;  %p1096_p3 = scmp.lt.s32.totalorder %s3503_s3, 5 }
  0x9e   : > { %p1097_p6 = pnand %p2590_p1, %p1096_p3 }
  0x9f   : > { %s3976_s24 = sand.u32 (!%p1097_p6), 1, %s3479_s6  }
  0xa0   : > { %1100 = sbr.rel (%p1097_p6) target bundleno = 2647 (0xa57), region = 116  ;;  %s3979_s10 = sshll.u32 (!%p1097_p6), %s3976_s24, 3 }
  0xa1   : > { %s1103_s0 = scalar_lea.sflag (!%p1097_p6), [#allocation8], %s3976_s24 }
  0xa5   : > { %3422 = dma.done.wait (%p3730_p7), %s1103_s0, 128  }
  0xa6   : > { %3424 = vsyncadd (%p3730_p7), %s1103_s0, 4294967168  ;;  %s4421_s12 = sld [smem:[#allocation51_spill]] }
  0xac   : > { %s3988_s8 = sand.u32 1, %s4421_s12  }
  0xad   : > { %s1113_s19 = scalar_lea.sflag [#allocation11], %s3988_s8 }
  0xae   : > { %3426 = dma.done.wait (%p3730_p7), %s1113_s19, 256  }
  0xaf   : > { %3428 = vsyncadd (%p3730_p7), %s1113_s19, 4294967040  ;;  %s4422_s1 = sld [smem:[#allocation45_spill]]  ;;  %s1133_s21 = scalar_lea.sflag [#allocation14], %s3988_s8 }
  0xb5   : > { %s3997_s22 = sand.u32 1, %s4422_s1  }
  0xb6   : > { %3430 = dma.done.wait (%p3754_p13), %s1133_s21, 272  }
  0xb7   : > { %3432 = vsyncadd (%p3754_p13), %s1133_s21, 4294967024  ;;  %s4007_s29 = sshll.u32 %s3997_s22, 4  ;;  %s1152_s18 = scalar_lea.sflag [#allocation17], %s3988_s8 }
  0xb8   : > { %3434 = dma.done.wait (%p3754_p13), %s1152_s18, 272  }
  0xb9   : > { %3436 = vsyncadd (%p3754_p13), %s1152_s18, 4294967024  ;;  %s1171_s13 = scalar_lea.sflag [#allocation20], %s3988_s8 }
  0xba   : > { %3438 = dma.done.wait (%p3754_p13), %s1171_s13, 272  }
  0xbb   : > { %3440 = vsyncadd (%p3754_p13), %s1171_s13, 4294967024  ;;  %s1190_s20 = scalar_lea.sflag [#allocation23], %s3988_s8 }
  0xbc   : > { %3442 = dma.done.wait (%p3754_p13), %s1190_s20, 272  }
  0xbd   : > { %3444 = vsyncadd (%p3754_p13), %s1190_s20, 4294967024  ;;  %s1209_s12 = scalar_lea.sflag [#allocation26], %s3988_s8 }
  0xbe   : > { %3446 = dma.done.wait (%p3754_p13), %s1209_s12, 272  }
  0xbf   : > { %3448 = vsyncadd (%p3754_p13), %s1209_s12, 4294967024  ;;  %s1228_s21 = scalar_lea.sflag [#allocation29], %s3988_s8 }
  0xc0   : > { %3450 = dma.done.wait (%p3754_p13), %s1228_s21, 32  }
  0xc1   : > { %3452 = vsyncadd (%p3754_p13), %s1228_s21, 4294967264  ;;  %s1246_s20 = scalar_lea.sflag [#allocation32], %s3988_s8 }
  0xc2   : > { %3454 = dma.done.wait (%p3754_p13), %s1246_s20, 272  }
  0xc3   : > { %3456 = vsyncadd (%p3754_p13), %s1246_s20, 4294967024  ;;  %s4424_s12 = sld [smem:[#allocation49_spill]] }
  0xc4   : > { %s4425_s1 = sld [smem:[#allocation48_spill]] }
  0xc5   : > { %s4426_s26 = sld [smem:[#allocation61_spill]] }
  0xc6   : > { %s4427_s28 = sld [smem:[#allocation64_spill]] }
  0xc7   : > { %s4428_s5 = sld [smem:[#allocation78_spill]] }
  0xc8   : > { %s4429_s4 = sld [smem:[#allocation77_spill]] }
  0xc9   : > { %p1414_p7 = scmp.lt.s32.totalorder %s4424_s12, 1  ;;  %s4430_s9 = sld [smem:[#allocation80_spill]] }
  0xca   : > { %p1418_p9 = scmp.lt.s32.totalorder %s4425_s1, 1  ;;  %p2604_p11 = scmp.ne.s32.totalorder %s4425_s1, 0 }
  0xcb   : > { %s4482_s12 = smov (!%p1414_p7, %s4424_s12), 1 }
  0xcc   : > { %s4055_s21 = scalar_select %p1418_p9, %s4425_s1, 1 }
  0xcd   : > { %s2601_s8 = sshll.u32 %s4482_s12, 3  ;;  %1437 = sbr.rel (%p2604_p11) target bundleno = 330 (0x14a), region = 188 }
  0xce   : > { %s1417_s20 = scalar_lea.vmem %s4426_s26, %s2601_s8  ;;  %s1420_s15 = scalar_lea.vmem %s4427_s28, %s4055_s21 }
  0xcf   : > { %s2688_s30 = sshll.u32 %s4055_s21, 4  ;;  %s1428_s23 = scalar_lea.vmem %s4428_s5, %s4055_s21  ;;  %v4069_v0 = vld [vmem:[%s1417_s20] sm:$0xff] }
  0xd0   : > { %s4074_s14 = scalar_lea.vmem %s4429_s4, %s2688_s30  ;;  %s1431_s13 = scalar_lea.vmem %s4430_s9, %s4055_s21 }
  0xd1   : > { %s1258_s8 = scalar_lea.vmem [#allocation33], %s4007_s29  ;;  %s4082_s26 = scalar_lea.vmem [#allocation34], %s3979_s10 }
  0xd2   : > { %v3507_v1 = vmov 0   ;;  %s4431_s5 = scalar_lea.vmem [#allocation7], %s3979_s10  ;;  %vm1445_vm0 = vcmask 261120  }
  0xd3   : > { %2842 = vset.pattern.permute.xlu0 %v3507_v1  ;;  %v1438_v2 = vld [vmem:[%s4431_s5] sm:$0xff] }
  0xd4   : > { %1441 = vperm.xlu0 %2842, %v4069_v0  }
 0x146   : > { %v1442_v3 = vpop.permute.xlu0 %1441 }
 0x147   : > { %v1444_v4 = vmul.f32 %v1442_v3, %v1438_v2 }
 0x149   : > { %1446 = vst.msk [vmem:[%s4082_s26] sm:$0xff] %vm1445_vm0, %v1444_v4 }
 0x14a PF: > { %vm1450_vm1 = vcmask 261120   ;;  %s4432_s16 = scalar_lea.vmem [#allocation24], %s4007_s29  ;;  %s4434_s27 = scalar_lea.vmem [#allocation12], %s3979_s10  ;;  %v3508_v18 = vmov 32.0   ;;  %vm1566_vm3 = vcmask 519168   ;;  %vm1664_vm7 = vcmask 130048  }
 0x14b   : > { %v2696_v6 = vld [vmem:[%s4432_s16 + $0x8] sm:$0xff]  ;;  %s4433_s4 = smov %s4432_s16  ;;  %s4435_s25 = scalar_lea.vmem [#allocation21], %s4007_s29  ;;  %2855 = vrcp.f32 %v3508_v18  ;;  %vm1750_vm8 = vcmask 1043456   ;;  %vm1526_vm9 = vcmask 257024   ;;  %vm1729_vm11 = vcmask 64512  }
 0x14c   : > { %v2695_v7 = vld [vmem:[%s4433_s4] sm:$0xff]  ;;  %s4436_s28 = smov %s4435_s25  ;;  %1639 = vmatpush.bf16.msra.mxu3 %v2696_v6  ;;  %s4437_s11 = scalar_lea.vmem [#allocation10], %s3979_s10 }
 0x14d   : > { %v1608_v9 = vld [vmem:[%s4434_s27] sm:$0xff]  ;;  %v1568_v12 = vld [vmem:[%s4437_s11] sm:$0xff]  ;;  %s4438_s30 = scalar_lea.vmem [#allocation18], %s4007_s29  ;;  %s4440_s10 = scalar_lea.vmem [#allocation25], %s3997_s22 }
 0x14e   : > { %v2694_v10 = vld [vmem:[%s4435_s25 + $0x8] sm:$0xff]  ;;  %s4439_s0 = smov %s4438_s30  ;;  %v1609_v15 = vpack.c.bf16 %v1608_v9, %v1608_v9  ;;  %v1569_v16 = vpack.c.bf16 %v1568_v12, %v1568_v12  ;;  %v2844_v30 = vld [vmem:[%s4440_s10] ss:$0 sm:$0xff]  ;;  %s4441_s19 = scalar_lea.vmem [#allocation22], %s3997_s22 }
 0x14f   : > { %v2693_v11 = vld [vmem:[%s4436_s28] sm:$0xff]  ;;  %1599 = vmatpush.bf16.msra.mxu2 %v2694_v10  ;;  %s3509_s1 = smov 96   ;;  %s4442_s18 = scalar_lea.vmem [#allocation19], %s3997_s22 }
 0x150   : > { %v1447_v5 = vld [vmem:[%s4082_s26] sm:$0xff]  ;;  %1640 = vmatpush.bf16.msra.mxu3 %v2695_v7  ;;  %s4443_s20 = scalar_lea.vmem [#allocation15], %s4007_s29  ;;  %s3510_s9 = smov 112  }
 0x151   : > { %v1451_v8 = vsel %vm1450_vm1, %v1447_v5, 0.0  ;;  %v2692_v13 = vld [vmem:[%s4438_s30 + $0x8] sm:$0xff]  ;;  %v1528_v17 = vpack.c.bf16 %v1447_v5, %v1447_v5  ;;  %v2856_v19 = vpop.eup %2855  ;;  %v2845_v31 = vld [vmem:[%s4441_s19] ss:$0 sm:$0xff]  ;;  %s4444_s12 = smov %s4443_s20  ;;  %s3511_s5 = smov 80  }
 0x152   : > { %1452 = vadd.xlane.f32.xlu0 %v1451_v8  ;;  %v2691_v14 = vld [vmem:[%s4439_s0] sm:$0xff]  ;;  %1558 = vmatpush.bf16.msra.mxu1 %v2692_v13  ;;  %v1455_v20 = vmul.f32 32.0, %v2856_v19  ;;  %vm1459_vm2 = vweird.f32 %v2856_v19  ;;  %s4446_s25 = scalar_lea.vmem [#allocation13], %s3997_s22  ;;  %s4448_s28 = scalar_lea.vmem [#allocation27], %s4007_s29 }
 0x153   : > { %1600 = vmatpush.bf16.msra.mxu2 %v2693_v11  ;;  %2640 = vmatmul.msk.bf16.vlgmr.msra.gmra.mxu3 %vm1450_vm1, %v1609_v15  ;;  %v2846_v46 = vld [vmem:[%s4442_s18] ss:$0 sm:$0xff]  ;;  %v2690_v51 = vld [vmem:[%s4443_s20 + $0x8] sm:$0xff]  ;;  %s4449_s11 = smov %s4448_s28  ;;  %s4450_s30 = scalar_lea.vmem [#allocation28], %s3997_s22 }
 0x154   : > { %v1456_v21 = vsub.f32 1.0, %v1455_v20  ;;  %1518 = vmatpush.bf16.msra.mxu0 %v2690_v51  ;;  %v2689_v52 = vld [vmem:[%s4444_s12] sm:$0xff]  ;;  %v3512_v51 = vmov -1e+30   ;;  %s4452_s0 = scalar_lea.vmem [#allocation31], %s3997_s22 }
 0x155   : > { %v2847_v11 = vld [vmem:[%s1420_s15] ss:$0 sm:$0xff]  ;;  %s4447_s15 = scalar_lea.vmem [#allocation16], %s3997_s22 }
 0x156   : > { %1559 = vmatpush.bf16.msra.mxu1 %v2691_v14  ;;  %2631 = vmatmul.msk.bf16.vlgmr.msra.gmra.mxu2 %vm1450_vm1, %v1569_v16  ;;  %v1457_v22 = vmul.f32 %v2856_v19, %v1456_v21  ;;  %v2848_v14 = vld [vmem:[%s4446_s25] ss:$0 sm:$0xff] }
 0x158   : > { %v1458_v23 = vadd.f32 %v2856_v19, %v1457_v22  ;;  %1519 = vmatpush.bf16.msra.mxu0 %v2689_v52 }
 0x159   : > { %2622 = vmatmul.msk.bf16.vlgmr.msra.gmra.mxu1 %vm1450_vm1, %v1528_v17 }
 0x15a   : > { %v4110_v24 = vsel %vm1459_vm2, %v2856_v19, %v1458_v23 }
 0x1c5   : > { %v1453_v25 = vpop.xlane.xlu0 %1452 }
 0x1c6   : > { %v1461_v26 = vmul.f32 %v4110_v24, %v1453_v25 }
 0x1c8   : > { %v4113_v27 = vsub.f32 %v1447_v5, %v1461_v26 }
 0x1ca   : > { %v1463_v28 = vmul.f32 %v4113_v27, %v4113_v27 }
 0x1cc   : > { %v1464_v29 = vsel %vm1450_vm1, %v1463_v28, 0.0  ;;  %v2849_v28 = vld [vmem:[%s4447_s15] ss:$0 sm:$0xff] }
 0x1cd   : > { %1465 = vadd.xlane.f32.xlu0 %v1464_v29 }
 0x1d6   : > { %v1642_v32 = vpop.f32.mrf.mxu3  ;;  %v1561_v47 = vpop.f32.mrf.mxu1 }
 0x1d7   : > { %v1643_v33 = vadd.f32 %v2844_v30, %v1642_v32  ;;  %v1562_v48 = vadd.f32 %v2846_v46, %v1561_v47 }
 0x1d9   : > { %v1602_v34 = vpop.f32.mrf.mxu2  ;;  %v1646_v36 = vpack.c.bf16 %v1643_v33, %v1643_v33  ;;  %v1565_v49 = vpack.c.bf16 %v1562_v48, %v1562_v48 }
 0x1da   : > { %v1603_v35 = vadd.f32 %v2845_v31, %v1602_v34 }
 0x1db   : > { %1647 = vst.msk [vmem:[#allocation5] sm:$0xf] %vm1566_vm3, %v1646_v36 }
 0x1dc   : > { %v1606_v37 = vpack.c.bf16 %v1603_v35, %v1603_v35  ;;  %1567 = vst.msk [vmem:[#allocation3] sm:$0xf] %vm1566_vm3, %v1565_v49 }
 0x1de   : > { %1607 = vst.msk [vmem:[#allocation4] sm:$0xf] %vm1566_vm3, %v1606_v37  ;;  %v1644_v38 = vpop.f32.mrf.mxu3  ;;  %v1563_v50 = vpop.f32.mrf.mxu1 }
 0x1e1   : > { %v1604_v39 = vpop.f32.mrf.mxu2 }
 0x1e2   : > { %v4124_v40 = vld [vmem:[#allocation5] sm:$0xf] }
 0x1e3   : > { %v1704_v41 = vunpack.c.l.b16 %v4124_v40  ;;  %v1656_v53 = vld [vmem:[#allocation3] sm:$0xf]  ;;  %v1798_v57 = vld [vmem:[#allocation5] sm:$0xf] }
 0x1e4   : > { %v1796_v54 = vld [vmem:[#allocation3] sm:$0xf]  ;;  %v1743_v55 = vunpack.c.l.b16 %v1656_v53  ;;  %v1855_v60 = vunpack.c.l.b16 %v1798_v57  ;;  %v1688_v22 = vsel %vm1664_vm7, %v1656_v53, 0 }
 0x1e5   : > { %v4127_v42 = vld [vmem:[#allocation4] sm:$0xf]  ;;  %v1705_v43 = vpack.c.b16 %v1704_v41, %v1704_v41  ;;  %v1831_v56 = vunpack.c.l.b16 %v1796_v54  ;;  %1697 = vmatpush.bf16.xpose.msrb.mxu1 %v1688_v22 }
 0x1e6   : > { %v1660_v44 = vunpack.c.l.b16 %v4127_v42  ;;  %v1744_v58 = vpack.c.b16 %v1743_v55, %v1743_v55  ;;  %v1797_v63 = vld [vmem:[#allocation4] sm:$0xf]  ;;  %v4142_v1 = vpack.c.b16 %v1855_v60, %v1855_v60 }
 0x1e7   : > { %1706 = vrot.lane.b32.xlu1 %v1705_v43, %s3509_s1  ;;  %v4137_v59 = vpack.c.b16 %v1831_v56, %v1831_v56  ;;  %v1800_v2 = vunpack.c.l.b16 %v1797_v63  ;;  %v2697_v43 = vld [vmem:[%s4448_s28] sm:$0xff] }
 0x1e8   : > { %v1661_v45 = vpack.c.b16 %v1660_v44, %v1660_v44  ;;  %1745 = vrot.lane.b32.xlu0 %v1744_v58, %s3509_s1  ;;  %v1648_v44 = vlaneseq }
 0x1e9   : > { %v1801_v4 = vpack.c.b16 %v1800_v2, %v1800_v2 }
 0x1ea   : > { %v1649_v46 = vshrl.u32 %v1648_v44, 7  ;;  %v1651_v47 = vand.u32 127, %v1648_v44  ;;  %v2850_v44 = vld [vmem:[%s4450_s30] ss:$0 sm:$0xff] }
 0x1ec   : > { %vm1652_vm10 = vcmp.ge.s32.totalorder %v1649_v46, %v1651_v47 }
 0x1ed   : > { %v1653_v52 = vsel %vm1652_vm10, 0.0, %v3512_v51 }
 0x1ef   : > { %1662 = vrot.lane.b32.xlu1 %v1661_v45, %s3509_s1 }
 0x1f0   : > { %1857 = vrot.lane.b32.xlu0 %v4142_v1, %s3510_s9 }
 0x1f7   : > { %1833 = vrot.lane.b32.xlu1 %v4137_v59, %s3510_s9 }
 0x1ff   : > { %1804 = vrot.lane.b32.xlu1 %v1801_v4, %s3511_s5 }
 0x240   : > { %v1466_v61 = vpop.xlane.xlu0 %1465 }
 0x241   : > { %v1467_v62 = vmul.f32 %v1466_v61, %v4110_v24 }
 0x243   : > { %v1468_v3 = vadd.f32 1e-08, %v1467_v62 }
 0x245   : > { %2857 = vrsqrt.f32 %v1468_v3  ;;  %vm1475_vm5 = vweird.f32 %v1468_v3 }
 0x24b   : > { %v2858_v5 = vpop.eup %2857 }
 0x24c   : > { %v1470_v6 = vmul.f32 %v2858_v5, %v1468_v3  ;;  %vm1476_vm4 = vweird.f32 %v2858_v5 }
 0x24d   : > { %vm1477_vm6 = vmor %vm1475_vm5, %vm1476_vm4 }
 0x24e   : > { %v1471_v7 = vmul.f32 %v2858_v5, %v1470_v6 }
 0x250   : > { %v1472_v8 = vmul.f32 0.5, %v1471_v7 }
 0x252   : > { %v1473_v9 = vsub.f32 1.5, %v1472_v8 }
 0x254   : > { %v1474_v10 = vmul.f32 %v2858_v5, %v1473_v9 }
 0x256   : > { %v1478_v12 = vsel %vm1477_vm6, %v2858_v5, %v1474_v10 }
 0x257   : > { %v1479_v13 = vmul.f32 %v1478_v12, %v4113_v27 }
 0x259   : > { %v1483_v15 = vmul.f32 %v2847_v11, %v1479_v13  ;;  %v1707_v18 = vpop.permute.xlu1 %1706 }
 0x25a   : > { %v1712_v19 = vsel %vm1664_vm7, %v1707_v18, 0  ;;  %v1746_v30 = vpop.permute.xlu0 %1745 }
 0x25b   : > { %v4155_v16 = vadd.f32 %v2848_v14, %v1483_v15  ;;  %1721 = vmatpush.bf16.xpose.msrb.mxu2 %v1712_v19  ;;  %v1752_v32 = vsel %vm1750_vm8, %v1746_v30, 0  ;;  %v3513_v14 = vmov 0.0  }
 0x25c   : > { %1761 = vmatpush.bf16.msrb.mxu3 %v1752_v32  ;;  %1654 = vst.msk [vmem:[#allocation6] sm:$0xff] %vm1450_vm1, %v3513_v14 }
 0x25d   : > { %v1488_v17 = vpack.c.bf16 %v4155_v16, %v4155_v16 }
 0x25f   : > { %2613 = vmatmul.msk.bf16.vlgmr.msra.gmra.mxu0 %vm1450_vm1, %v1488_v17 }
 0x261   : > { %v1663_v20 = vpop.permute.xlu1 %1662 }
 0x262   : > { %2643 = vmatmul.msk.bf16.vlgmr.msrb.gmra.mxu2 %vm1664_vm7, %v4124_v40  ;;  %v1669_v21 = vsel %vm1664_vm7, %v1663_v20, 0  ;;  %v1858_v13 = vpop.permute.xlu0 %1857 }
 0x263   : > { %1678 = vmatpush.bf16.xpose.msrb.mxu0 %v1669_v21 }
 0x269   : > { %v1834_v23 = vpop.permute.xlu1 %1833 }
 0x26a   : > { %v1839_v25 = vsel %vm1664_vm7, %v1834_v23, 0  ;;  %v1767_v23 = vld [vmem:[#allocation6] sm:$0xff] }
 0x26b   : > { %1848 = vmatpush.bf16.xpose.msra.mxu2 %v1839_v25  ;;  %1787 = vmatpush.bf16.msra.mxu0 %v2697_v43 }
 0x26f   : > { %2641 = vmatmul.msk.bf16.vlgmr.msrb.gmra.mxu0 %vm1664_vm7, %v4127_v42 }
 0x271   : > { %v1805_v26 = vpop.permute.xlu1 %1804 }
 0x272   : > { %v1810_v27 = vsel %vm1664_vm7, %v1805_v26, 0 }
 0x273   : > { %1819 = vmatpush.bf16.xpose.msra.mxu1 %v1810_v27 }
 0x2dc   : > { %v1521_v29 = vpop.f32.mrf.mxu0 }
 0x2dd   : > { %v1522_v31 = vadd.f32 %v2849_v28, %v1521_v29 }
 0x2df   : > { %v1525_v33 = vpack.c.bf16 %v1522_v31, %v1522_v31 }
 0x2e1   : > { %1527 = vst.msk [vmem:[#allocation2] sm:$0xf] %vm1526_vm9, %v1525_v33  ;;  %v2698_v33 = vld [vmem:[%s4449_s11 + $0x8] sm:$0xff] }
 0x2e4   : > { %v1523_v34 = vpop.f32.mrf.mxu0 }
 0x2e5   : > { %v1723_v38 = vpop.f32.mrf.mxu2 }
 0x2e8   : > { %v1655_v35 = vld [vmem:[#allocation2] sm:$0xf] }
 0x2e9   : > { %v1795_v36 = vld [vmem:[#allocation2] sm:$0xf]  ;;  %2642 = vmatmul.msk.bf16.vlgmr.msrb.gmra.mxu1 %vm1664_vm7, %v1655_v35 }
 0x2ea   : > { %v1826_v37 = vunpack.c.l.b16 %v1795_v36  ;;  %1935 = vmatpush.bf16.msrb.mxu1 %v2698_v33 }
 0x2ec   : > { %v1827_v39 = vpack.c.b16 %v1826_v37, %v1826_v37  ;;  %v1680_v40 = vpop.f32.mrf.mxu0 }
 0x2ed   : > { %v1725_v41 = vpop.f32.mrf.mxu2 }
 0x2ee   : > { %1828 = vrot.lane.b32.xlu1 %v1827_v39, %s3510_s9 }
 0x2f4   : > { %v1682_v42 = vpop.f32.mrf.mxu0 }
 0x2f6   : > { %1802 = vrot.lane.b32.xlu1 %v1801_v4, %s3510_s9 }
 0x2fe   : > { %1894 = vrot.lane.b32.xlu1 %v4137_v59, %s3511_s5 }
 0x360   : > { %v1829_v45 = vpop.permute.xlu1 %1828 }
 0x361   : > { %2651 = vmatmul.msk.bf16.vlgmr.msra.gmra.mxu2 %vm1664_vm7, %v1829_v45 }
 0x366   : > { %v1699_v48 = vpop.f32.mrf.mxu1 }
 0x367   : > { %v1700_v49 = vadd.f32 %v1699_v48, %v1680_v40 }
 0x368   : > { %v1803_v50 = vpop.permute.xlu1 %1802 }
 0x369   : > { %2650 = vmatmul.msk.bf16.vlgmr.msra.gmra.mxu1 %vm1664_vm7, %v1803_v50  ;;  %v1727_v53 = vadd.f32 %v1723_v38, %v1700_v49 }
 0x36b   : > { %v1728_v54 = vadd.f32 %v1727_v53, %v1653_v52 }
 0x36d   : > { %v1730_v55 = vsel %vm1729_vm11, %v1728_v54, -inf }
 0x36e   : > { %v1701_v56 = vpop.f32.mrf.mxu1  ;;  %1731 = vmax.xlane.f32.xlu2 %v1730_v55  ;;  %v2700_v55 = vld [vmem:[%s4074_s14 + $0x8] sm:$0xff] }
 0x36f   : > { %2012 = vmatpush.bf16.msrb.mxu2 %v2700_v55  ;;  %v2699_v56 = vld [vmem:[%s4074_s14] sm:$0xff]  ;;  %s4451_s14 = scalar_lea.vmem [#allocation30], %s3997_s22 }
 0x370   : > { %v1895_v57 = vpop.permute.xlu1 %1894 }
 0x371   : > { %v1900_v58 = vsel %vm1750_vm8, %v1895_v57, 0  ;;  %v2702_v57 = vld [vmem:[%s1258_s8 + $0x8] sm:$0xff] }
 0x372   : > { %1909 = vmatpush.bf16.msrb.mxu0 %v1900_v58 }
 0x373   : > { %2013 = vmatpush.bf16.msrb.mxu2 %v2699_v56 }
 0x3e1   : > { %v1732_v59 = vpop.xlane.xlu2 %1731 }
 0x3e2   : > { %v1733_v60 = vsub.f32 %v1728_v54, %v1732_v59  ;;  %v2701_v59 = vld [vmem:[%s1258_s8] sm:$0xff] }
 0x3e4   : > { %v1850_v61 = vpop.f32.mrf.mxu2  ;;  %v1734_v62 = vmul.f32 1.442695, %v1733_v60 }
 0x3e6   : > { %v1821_v63 = vpop.f32.mrf.mxu1  ;;  %2859 = vpow2.f32 %v1734_v62 }
 0x3e7   : > { %v1851_v2 = vadd.f32 %v1850_v61, %v1821_v63 }
 0x3ec   : > { %v1852_v3 = vpop.f32.mrf.mxu2  ;;  %v2860_v4 = vpop.eup %2859 }
 0x3ed   : > { %v1736_v6 = vsel %vm1729_vm11, %v2860_v4, 0.0 }
 0x3ee   : > { %v1823_v5 = vpop.f32.mrf.mxu1  ;;  %1737 = vadd.xlane.f32.xlu2 %v1736_v6 }
 0x3ef   : > { %v2851_v5 = vld [vmem:[%s4451_s14] ss:$0 sm:$0xff] }
 0x406   : > { %1859 = vrot.lane.b32.xlu2 %v4142_v1, %s3511_s5 }
 0x461   : > { %v1738_v7 = vpop.xlane.xlu2 %1737 }
 0x462   : > { %2861 = vrcp.f32 %v1738_v7  ;;  %v2852_v7 = vld [vmem:[%s4452_s0] ss:$0 sm:$0xff] }
 0x468   : > { %v2862_v8 = vpop.eup %2861 }
 0x469   : > { %v1740_v9 = vmul.f32 %v2862_v8, %v2860_v4  ;;  %v1860_v10 = vpop.permute.xlu2 %1859 }
 0x46a   : > { %v1865_v11 = vsel %vm1664_vm7, %v1860_v10, 0 }
 0x46b   : > { %1874 = vmatpush.bf16.xpose.msra.mxu3 %v1865_v11  ;;  %v1741_v12 = vpack.c.bf16 %v1740_v9, %v1740_v9 }
 0x46d   : > { %2644 = vmatmul.msk.bf16.vlgmr.msrb.gmra.mxu3 %vm1729_vm11, %v1741_v12  ;;  %v3514_v12 = vmov 0  }
 0x46e   : > { %2843 = vset.pattern.permute.xlu0 %v3514_v12 }
 0x473   : > { %2050 = vmatpush.bf16.msrb.mxu3 %v2702_v57 }
 0x477   : > { %2051 = vmatpush.bf16.msrb.mxu3 %v2701_v59 }
 0x47d   : > { %2652 = vmatmul.msk.bf16.vlgmr.msra.gmra.mxu3 %vm1664_vm7, %v1858_v13  ;;  %v2853_v13 = vld [vmem:[%s1428_s23] ss:$0 sm:$0xff]  ;;  %s4455_s23 = sld [smem:[#allocation48_spill]] }
 0x483   : > { %p2677_p12 = scmp.ne.s32.totalorder %s4455_s23, 1 }
 0x484   : > { %s4456_s18 = sld [smem:[#allocation81_spill]] (!%p2677_p12) }
 0x485   : > { %s4457_s9 = sld [smem:[#allocation82_spill]] (!%p2677_p12) }
 0x4f0   : > { %v1763_v15 = vpop.f32.mrf.mxu3 }
 0x4f1   : > { %v1768_v17 = vpack.c.bf16 %v1763_v15, %v1763_v15 }
 0x4f3   : > { %2649 = vmatmul.msk.bf16.vlgmr.msra.gmra.mxu0 %vm1664_vm7, %v1768_v17 }
 0x4f8   : > { %v1765_v1 = vpop.f32.mrf.mxu3 }
 0x500   : > { %v1876_v18 = vpop.f32.mrf.mxu3 }
 0x501   : > { %v1880_v19 = vadd.f32 %v1876_v18, %v1851_v2 }
 0x503   : > { %v1881_v20 = vadd.f32 %v1880_v19, %v1653_v52  ;;  %v2854_v19 = vld [vmem:[%s1431_s13] ss:$0 sm:$0xff] }
 0x505   : > { %v1882_v21 = vsel %vm1729_vm11, %v1881_v20, -inf }
 0x506   : > { %1883 = vmax.xlane.f32.xlu2 %v1882_v21 }
 0x508   : > { %v1878_v22 = vpop.f32.mrf.mxu3 }
 0x570   : > { %v1789_v25 = vpop.f32.mrf.mxu0 }
 0x571   : > { %v1793_v26 = vadd.f32 %v1789_v25, %v1767_v23 }
 0x573   : > { %1794 = vst.msk [vmem:[#allocation6] sm:$0xff] %vm1450_vm1, %v1793_v26 }
 0x578   : > { %v1791_v27 = vpop.f32.mrf.mxu0 }
 0x579   : > { %v1884_v28 = vpop.xlane.xlu2 %1883 }
 0x57a   : > { %v1885_v29 = vsub.f32 %v1881_v20, %v1884_v28  ;;  %v1915_v41 = vld [vmem:[#allocation6] sm:$0xff] }
 0x57c   : > { %v1886_v30 = vmul.f32 1.442695, %v1885_v29 }
 0x57e   : > { %2863 = vpow2.f32 %v1886_v30 }
 0x584   : > { %v2864_v31 = vpop.eup %2863 }
 0x585   : > { %v1888_v32 = vsel %vm1729_vm11, %v2864_v31, 0.0 }
 0x586   : > { %1889 = vadd.xlane.f32.xlu0 %v1888_v32 }
 0x59a   : > { %2060 = vperm.xlu0 %2843, %v4069_v0  }
 0x5f9   : > { %v1890_v34 = vpop.xlane.xlu0 %1889 }
 0x5fa   : > { %2865 = vrcp.f32 %v1890_v34 }
 0x600   : > { %v2866_v35 = vpop.eup %2865 }
 0x601   : > { %v1892_v36 = vmul.f32 %v2866_v35, %v2864_v31 }
 0x603   : > { %v1893_v37 = vpack.c.bf16 %v1892_v36, %v1892_v36 }
 0x605   : > { %2653 = vmatmul.msk.bf16.vlgmr.msrb.gmra.mxu0 %vm1729_vm11, %v1893_v37 }
 0x60c   : > { %v2061_v0 = vpop.permute.xlu0 %2060 }
 0x682   : > { %v1911_v38 = vpop.f32.mrf.mxu0 }
 0x683   : > { %v1916_v39 = vpack.c.bf16 %v1911_v38, %v1911_v38 }
 0x685   : > { %2658 = vmatmul.msk.bf16.vlgmr.msrb.gmra.mxu1 %vm1664_vm7, %v1916_v39 }
 0x68a   : > { %v1913_v40 = vpop.f32.mrf.mxu0 }
 0x702   : > { %v1937_v42 = vpop.f32.mrf.mxu1 }
 0x703   : > { %v1941_v43 = vadd.f32 %v1937_v42, %v1915_v41 }
 0x705   : > { %1942 = vst.msk [vmem:[#allocation6] sm:$0xff] %vm1450_vm1, %v1941_v43 }
 0x70a   : > { %v1939_v45 = vpop.f32.mrf.mxu1 }
 0x70c   : > { %v1943_v46 = vld [vmem:[#allocation6] sm:$0xff] }
 0x70d   : > { %v1948_v47 = vadd.f32 %v2850_v44, %v1943_v46 }
 0x70f   : > { %v1949_v48 = vadd.f32 %v1948_v47, %v4155_v16 }
 0x711   : > { %v1952_v49 = vsel %vm1450_vm1, %v1949_v48, 0.0 }
 0x712   : > { %1953 = vadd.xlane.f32.xlu1 %v1952_v49 }
 0x785   : > { %v1954_v50 = vpop.xlane.xlu1 %1953 }
 0x786   : > { %v1955_v51 = vmul.f32 %v1954_v50, %v4110_v24 }
 0x788   : > { %v1956_v52 = vsub.f32 %v1949_v48, %v1955_v51 }
 0x78a   : > { %v1957_v53 = vmul.f32 %v1956_v52, %v1956_v52 }
 0x78c   : > { %v1958_v54 = vsel %vm1450_vm1, %v1957_v53, 0.0 }
 0x78d   : > { %1959 = vadd.xlane.f32.xlu2 %v1958_v54 }
 0x800   : > { %v1960_v16 = vpop.xlane.xlu2 %1959 }
 0x801   : > { %v1961_v58 = vmul.f32 %v1960_v16, %v4110_v24 }
 0x803   : > { %v1962_v60 = vadd.f32 1e-08, %v1961_v58 }
 0x805   : > { %2867 = vrsqrt.f32 %v1962_v60  ;;  %vm1969_vm13 = vweird.f32 %v1962_v60 }
 0x80b   : > { %v2868_v61 = vpop.eup %2867 }
 0x80c   : > { %v1964_v62 = vmul.f32 %v2868_v61, %v1962_v60  ;;  %vm1970_vm12 = vweird.f32 %v2868_v61 }
 0x80d   : > { %vm1971_vm14 = vmor %vm1969_vm13, %vm1970_vm12 }
 0x80e   : > { %v1965_v63 = vmul.f32 %v2868_v61, %v1964_v62 }
 0x810   : > { %v1966_v2 = vmul.f32 0.5, %v1965_v63 }
 0x812   : > { %v1967_v3 = vsub.f32 1.5, %v1966_v2 }
 0x814   : > { %v1968_v4 = vmul.f32 %v2868_v61, %v1967_v3 }
 0x816   : > { %v1972_v6 = vsel %vm1971_vm14, %v2868_v61, %v1968_v4 }
 0x817   : > { %v1973_v8 = vmul.f32 %v1972_v6, %v1956_v52 }
 0x819   : > { %v1977_v9 = vmul.f32 %v2851_v5, %v1973_v8 }
 0x81b   : > { %v1981_v10 = vadd.f32 %v2852_v7, %v1977_v9 }
 0x81d   : > { %v1982_v11 = vpack.c.bf16 %v1981_v10, %v1981_v10 }
 0x81f   : > { %2667 = vmatmul.msk.bf16.vlgmr.msrb.gmra.mxu2 %vm1450_vm1, %v1982_v11 }
 0x8a2   : > { %v2015_v14 = vpop.f32.mrf.mxu2 }
 0x8a3   : > { %v2016_v15 = vadd.f32 %v2853_v13, %v2015_v14 }
 0x8a5   : > { %v2019_v17 = vmax.f32 %v2016_v15, 0.0 }
 0x8a7   : > { %v2020_v1 = vpack.c.bf16 %v2019_v17, %v2019_v17 }
 0x8a9   : > { %2676 = vmatmul.msk.bf16.vlgmr.msrb.gmra.mxu3 %vm1450_vm1, %v2020_v1 }
 0x8aa   : > { %v2017_v18 = vpop.f32.mrf.mxu2 }
 0x92c   : > { %v2053_v20 = vpop.f32.mrf.mxu3 }
 0x92d   : > { %v2054_v21 = vadd.f32 %v2854_v19, %v2053_v20 }
 0x92f   : > { %v2057_v22 = vadd.f32 %v2054_v21, %v1981_v10 }
 0x930   : > { %2068 = sbr.rel (%p2677_p12) target bundleno = 2626 (0xa42), region = 192 }
 0x931   : > { %v2063_v23 = vmul.f32 %v2061_v0, %v2057_v22 }
 0x933   : > { %2064 = vst.msk [vmem:[%s4082_s26] sm:$0xff] %vm1450_vm1, %v2063_v23 }
 0x934   : > { %v2055_v25 = vpop.f32.mrf.mxu3 }
 0x935   : > { %v2071_v26 = vsel %vm1450_vm1, %v2063_v23, 0.0  ;;  %v2869_v41 = vld [vmem:[%s4456_s18] ss:$0 sm:$0xff] }
 0x936   : > { %2072 = vadd.xlane.f32.xlu0 %v2071_v26 }
 0x9a9   : > { %v2073_v27 = vpop.xlane.xlu0 %2072 }
 0x9aa   : > { %v2074_v28 = vmul.f32 %v2073_v27, %v4110_v24 }
 0x9ac   : > { %v2075_v29 = vsub.f32 %v2063_v23, %v2074_v28 }
 0x9ae   : > { %v2076_v30 = vmul.f32 %v2075_v29, %v2075_v29 }
 0x9b0   : > { %v2077_v31 = vsel %vm1450_vm1, %v2076_v30, 0.0 }
 0x9b1   : > { %2078 = vadd.xlane.f32.xlu0 %v2077_v31 }
 0xa24   : > { %v2079_v32 = vpop.xlane.xlu0 %2078 }
 0xa25   : > { %v2080_v33 = vmul.f32 %v2079_v32, %v4110_v24  ;;  %v2870_v24 = vld [vmem:[%s4457_s9] ss:$0 sm:$0xff] }
 0xa27   : > { %v2081_v34 = vadd.f32 1e-08, %v2080_v33 }
 0xa29   : > { %2871 = vrsqrt.f32 %v2081_v34  ;;  %vm2088_vm0 = vweird.f32 %v2081_v34 }
 0xa2f   : > { %v2872_v35 = vpop.eup %2871 }
 0xa30   : > { %v2083_v36 = vmul.f32 %v2872_v35, %v2081_v34  ;;  %vm2089_vm15 = vweird.f32 %v2872_v35 }
 0xa31   : > { %vm2090_vm2 = vmor %vm2088_vm0, %vm2089_vm15 }
 0xa32   : > { %v2084_v37 = vmul.f32 %v2872_v35, %v2083_v36 }
 0xa34   : > { %v2085_v38 = vmul.f32 0.5, %v2084_v37 }
 0xa36   : > { %v2086_v39 = vsub.f32 1.5, %v2085_v38 }
 0xa38   : > { %v2087_v40 = vmul.f32 %v2872_v35, %v2086_v39 }
 0xa3a   : > { %v2091_v42 = vsel %vm2090_vm2, %v2872_v35, %v2087_v40 }
 0xa3b   : > { %v2092_v43 = vmul.f32 %v2091_v42, %v2075_v29 }
 0xa3d   : > { %v2096_v44 = vmul.f32 %v2869_v41, %v2092_v43 }
 0xa3f   : > { %v2100_v45 = vadd.f32 %v2870_v24, %v2096_v44 }
 0xa41   : > { %2101 = vst.msk [vmem:[%s4082_s26] sm:$0xff] %vm1450_vm1, %v2100_v45 }
 0xa42 PF: > { %s4458_s5 = sld [smem:[#allocation49_spill]]  ;;  %s2115_s11 = sshll.u32 %s4082_s26, 4  ;;  %s2116_s11 = int_to_ptr.vmem [resolvable:$true] %s2115_s11 }
 0xa43   : > { %s4460_s15 = sld [smem:[#allocation83_spill]]  ;;  %s2103_s14 = scalar_lea.sflag [#allocation9], %s3976_s24 }
 0xa48   : > { %s2679_s4 = sshll.u32 %s4458_s5, 3 }
 0xa49   : > { %s2113_s28 = scalar_lea.hbm %s4460_s15, %s2679_s4  ;;  %s3369_s22 = scalar_lea.hbm %s4460_s15, 16 }
 0xa4a   : > { %s2117_s30 = sshll.u32 %s2113_s28, 4  ;;  %s2118_s30 = int_to_ptr.hbm [resolvable:$true] %s2117_s30 }
 0xa4b   : > { %s3363_s0 = sshra.s32 %s2118_s30, 4  ;;  %s3364_s0 = int_to_ptr.hbm [resolvable:$true] %s3363_s0 }
 0xa4c   : > { %s3365_s29 = scalar_lea.hbm %s3364_s0, 8  ;;  %p3370_p8 = scmp.lt.s32.totalorder %s3364_s0, %s4460_s15 }
 0xa4d   : > { %p3366_p13 = scmp.ne.s32.totalorder %s3364_s0, %s3365_s29  ;;  %p3371_p2 = scmp.lt.s32.totalorder %s3369_s22, %s3365_s29 }
 0xa4f   : > { %p3367_p0 = pnand %p3366_p13, %p3762_p4  ;;  %p3372_p1 = por %p3371_p2, %p3370_p8 }
 0xa51   : > { %p3368_p5 = pneg %p3367_p0 }
 0xa53   : > { %p3373_p3 = pnand %p3372_p1, %p3368_p5 }
 0xa55   : > { %3376 = shalt.err (!%p3373_p3)
}
 0xa56   : > { %2737 = dma.vmem_to_hbm [thread:$0]  (%p3762_p4), %s2116_s11, 128, %s2118_s30, %s2103_s14  }
 0xa57 PF: > { %s4461_s24 = sld [smem:[#allocation47_spill]]  ;;  %p2743_p6 = scmp.ge.s32.totalorder %s3503_s3, 2 }
 0xa59   : > { %p2740_p7 = pnand %p2743_p6, %p3769_p10 }
 0xa5b   : > { %p2741_p9 = pneg %p2740_p7 }
 0xa5d   : > { %s2129_s23 = sand.u32 1, %s4461_s24  }
 0xa5e   : > { %s2130_s21 = scalar_lea.sflag [#allocation9], %s2129_s23 }
 0xa5f   : > { %3458 = dma.done.wait (%p2741_p9), %s2130_s21, 128  }
 0xa60   : > { %3460 = vsyncadd (%p2741_p9), %s2130_s21, 4294967168  ;;  %s64_s3 = sadd.s32 1, %s3503_s3   ;;  %s4463_s5 = sld [smem:[#allocation45_spill]] }
 0xa61   : > { %p61_p11 = scmp.ge.s32.totalorder %s64_s3, 6   ;;  %s4464_s26 = sld [smem:[#allocation46_spill]] }
 0xa62   : > { %s4465_s27 = sld [smem:[#allocation55_spill]]  ;;  %s4470_s28 = smov %s3479_s6 }
 0xa63   : > { %s4466_s13 = sld [smem:[#allocation56_spill]]  ;;  %s4471_s6 = smov %s3483_s2 }
 0xa64   : > { %s4467_s0 = sld [smem:[#allocation50_spill]]  ;;  %s4473_s29 = smov %s3495_s7 }
 0xa65   : > { %s4468_s18 = sld [smem:[#allocation52_spill]] }
 0xa66   : > { %s4469_s30 = sld [smem:[#allocation53_spill]] }
 0xa67   :  { %63 = sbr.rel (!%p61_p11) target bundleno = 50 (0x32), region = 376 }
 0xa69   : > { %s4472_s2 = smov %s4466_s13 }
 0xa6b   : > { %s4474_s7 = smov %s4468_s18 }
 0xa6c   :  { %2136 = vsyncpa [#allocation8], 1 }
 0xa6d   :  { %2138 = vsyncpa [#allocation8 + $0x1], 1 }
 0xa6e   :  { %2139 = vsyncpa [#allocation11], 1 }
 0xa6f   :  { %2141 = vsyncpa [#allocation11 + $0x1], 1 }
 0xa70   :  { %2142 = vsyncpa [#allocation14], 1 }
 0xa71   :  { %2144 = vsyncpa [#allocation14 + $0x1], 1 }
 0xa72   :  { %2145 = vsyncpa [#allocation17], 1 }
 0xa73   :  { %2147 = vsyncpa [#allocation17 + $0x1], 1 }
 0xa74   :  { %2148 = vsyncpa [#allocation20], 1 }
 0xa75   :  { %2150 = vsyncpa [#allocation20 + $0x1], 1 }
 0xa76   :  { %2151 = vsyncpa [#allocation23], 1 }
 0xa77   :  { %2153 = vsyncpa [#allocation23 + $0x1], 1 }
 0xa78   :  { %2154 = vsyncpa [#allocation26], 1 }
 0xa79   :  { %2156 = vsyncpa [#allocation26 + $0x1], 1 }
 0xa7a   :  { %2157 = vsyncpa [#allocation29], 1 }
 0xa7b   :  { %2159 = vsyncpa [#allocation29 + $0x1], 1 }
 0xa7c   :  { %2160 = vsyncpa [#allocation32], 1 }
 0xa7d   :  { %2162 = vsyncpa [#allocation32 + $0x1], 1 }
 0xa7e   :  { %2163 = vsyncpa [#allocation9], 1 }
 0xa7f   :  { %2165 = vsyncpa [#allocation9 + $0x1], 1 }

</bundles_post_ra>
